<compile_context>
chip_gen: v7x
topology: tpu7x:2x2x1
jax: 0.10.0
libtpu: 0.0.40
codegen_flags: <defaults>
</compile_context>

<pallas_src>
import functools

import jax
import jax.numpy as jnp
from jax import lax
from jax.experimental import pallas as pl
from jax.experimental.pallas import tpu as pltpu

BN_EPS = 1e-5


def _bottleneck_kernel(x_ref, w1_ref, w2_ref, w3_ref, s2_ref,
                       aux1_ref, aux2_ref, aux3_ref, out_ref,
                       *, N, H, W, C, D, K, mxu_bf16):
    R = N * H
    P = (K - 1) // 2
    inv_cnt = 1.0 / float(R * W)

    def mxu_in(a):
        # Optional bf16 cast at the MXU boundary (v6e / v7x fast path).
        # Accumulation (preferred_element_type) and all elementwise math stay f32.
        return a.astype(jnp.bfloat16) if mxu_bf16 else a

    def lane_group_sum(v, group):
        # v: (1, L) with L = W*group, lane l = w*group + c.  Returns, at every
        # lane, the sum over all lanes with the same channel residue c, i.e. the
        # per-channel total already broadcast back to the packed lane layout.
        # Cyclic roll-accumulate -> direction independent; runs on the XLU.
        L = v.shape[-1]
        reps = L // group
        if reps & (reps - 1) == 0:          # power-of-two replica count: log tree
            s = group
            while s < L:
                v = v + pltpu.roll(v, shift=s, axis=1)
                s *= 2
            return v
        acc = v                              # general fallback: linear accumulate
        for j in range(1, reps):
            acc = acc + pltpu.roll(v, shift=j * group, axis=1)
        return acc

    def relu_bias_bn(z, aux_ref, nchan):
        # z: (R, W*nchan) raw conv output.
        # aux_ref: (1, 3*W*nchan) packed [bias | gamma | beta], pre-tiled to lanes.
        L = W * nchan
        bias = aux_ref[:, 0:L]
        gamma = aux_ref[:, L:2 * L]
        beta = aux_ref[:, 2 * L:3 * L]
        a = jnp.maximum(z + bias, 0.0)
        mu = lane_group_sum(jnp.sum(a, axis=0, keepdims=True), nchan) * inv_cnt
        diff = a - mu
        var = lane_group_sum(jnp.sum(diff * diff, axis=0, keepdims=True),
                             nchan) * inv_cnt
        scale = gamma * lax.rsqrt(var + BN_EPS)
        return diff * scale + beta

    x = x_ref[...]                                               # (R, W*C)

    # ---- conv1 (1x1): one block-diagonal packed matmul, contraction W*C ------
    z1 = jnp.dot(mxu_in(x), w1_ref[...], preferred_element_type=jnp.float32)
    h1 = relu_bias_bn(z1, aux1_ref, D)                           # (R, W*D)

    # ---- conv2 (KxK, 'same'): banded-W weights + row-shift matmuls for H -----
    acc = None
    for kh in range(K):                      # static unroll, K is small
        if kh == P:
            src = h1                         # center tap: identity shift
        else:
            src = jnp.dot(s2_ref[kh], mxu_in(h1),
                          preferred_element_type=jnp.float32)
        term = jnp.dot(mxu_in(src), w2_ref[kh],
                       preferred_element_type=jnp.float32)
        acc = term if acc is None else acc + term
    h2 = relu_bias_bn(acc, aux2_ref, D)                          # (R, W*D)

    # ---- conv3 (1x1) ----------------------------------------------------------
    z3 = jnp.dot(mxu_in(h2), w3_ref[...], preferred_element_type=jnp.float32)
    out_ref[...] = relu_bias_bn(z3, aux3_ref, C)                 # (R, W*C)


@functools.partial(jax.jit, static_argnames=("kernel_size", "use_bf16_mxu"))
def bottleneck_forward(x_nchw, params, *, kernel_size, use_bf16_mxu=False):
    (w1, b1, w2, b2, w3, b3, g1, be1, g2, be2, g3, be3) = params
    if kernel_size % 2 != 1:
        raise ValueError("the 'same'-padding packing assumes odd kernel_size "
                         "(module uses padding=(k-1)//2).")
    x = jnp.transpose(x_nchw, (0, 2, 3, 1)).astype(jnp.float32)   # NCHW -> NHWC
    N, H, W, C = x.shape
    D = w1.shape[1]
    K = kernel_size
    P = (K - 1) // 2
    R = N * H

    # Lane-dense packing: row = n*H + h, lane = w*C + c.
    xp = x.reshape(R, W * C)

    f32 = jnp.float32
    eye_w = jnp.eye(W, dtype=f32)
    w1p = jnp.kron(eye_w, w1)                                     # (W*C, W*D)
    w3p = jnp.kron(eye_w, w3)                                     # (W*D, W*C)
    # conv2: per-kh banded weights (W taps folded in) + per-kh row-shift matrices.
    w2p = jnp.stack([
        sum(jnp.kron(jnp.eye(W, k=P - kw, dtype=f32), w2[kh, kw])
            for kw in range(K))
        for kh in range(K)])                                      # (K, W*D, W*D)
    eye_n = jnp.eye(N, dtype=f32)
    s2p = jnp.stack([jnp.kron(eye_n, jnp.eye(H, k=kh - P, dtype=f32))
                     for kh in range(K)])                         # (K, R, R)

    def pack_aux(bias, gamma, beta):          # -> (1, 3*W*ch): [bias|gamma|beta]
        return jnp.concatenate([jnp.tile(bias, (1, W)),
                                jnp.tile(gamma, (1, W)),
                                jnp.tile(beta, (1, W))], axis=1)

    aux1 = pack_aux(b1, g1, be1)                                  # (1, 3*W*D)
    aux2 = pack_aux(b2, g2, be2)                                  # (1, 3*W*D)
    aux3 = pack_aux(b3, g3, be3)                                  # (1, 3*W*C)

    if use_bf16_mxu:          # v6e / v7x: bf16 operands at the MXU, f32 accumulate
        w1p, w2p, w3p, s2p = (a.astype(jnp.bfloat16)
                              for a in (w1p, w2p, w3p, s2p))

    vmem = pl.BlockSpec(memory_space=pltpu.MemorySpace.VMEM)
    kernel = functools.partial(_bottleneck_kernel, N=N, H=H, W=W, C=C, D=D, K=K,
                               mxu_bf16=use_bf16_mxu)
    out = pl.pallas_call(
        kernel,
        out_shape=jax.ShapeDtypeStruct((R, W * C), jnp.float32),  # lane-dense out
        in_specs=[vmem] * 8,
        out_specs=vmem,
    )(xp, w1p, w2p, w3p, s2p, aux1, aux2, aux3)

    return jnp.transpose(out.reshape(N, H, W, C), (0, 3, 1, 2))   # NHWC -> NCHW


def _reference_forward(x_nchw, params, kernel_size):
    """Pure-JAX/XLA reference with identical semantics (for in-script self-check)."""
    (w1, b1, w2, b2, w3, b3, g1, be1, g2, be2, g3, be3) = params
    P = (kernel_size - 1) // 2
    x = jnp.transpose(x_nchw, (0, 2, 3, 1)).astype(jnp.float32)
    hi = lax.Precision.HIGHEST

    def bn(a, g, be):
        mu = jnp.mean(a, axis=(0, 1, 2), keepdims=True)
        var = jnp.mean((a - mu) ** 2, axis=(0, 1, 2), keepdims=True)
        return ((a - mu) * lax.rsqrt(var + BN_EPS) * g.reshape(1, 1, 1, -1)
                + be.reshape(1, 1, 1, -1))

    h = jnp.einsum("nhwc,cd->nhwd", x, w1, precision=hi) + b1.reshape(1, 1, 1, -1)
    h = bn(jax.nn.relu(h), g1, be1)
    h = lax.conv_general_dilated(h, w2, (1, 1), [(P, P), (P, P)],
                                 dimension_numbers=("NHWC", "HWIO", "NHWC"),
                                 precision=hi)
    h = bn(jax.nn.relu(h + b2.reshape(1, 1, 1, -1)), g2, be2)
    h = jnp.einsum("nhwd,dc->nhwc", h, w3, precision=hi) + b3.reshape(1, 1, 1, -1)
    h = bn(jax.nn.relu(h), g3, be3)
    return jnp.transpose(h, (0, 3, 1, 2))


def init_params(key, in_c, kernel_size, depth):
    """Deterministic parameter init (PyTorch-like uniform bounds)."""
    k1, k2, k3, k4, k5, k6 = jax.random.split(key, 6)

    def unif(k, shape, fan_in):
        bound = 1.0 / jnp.sqrt(float(fan_in))
        return jax.random.uniform(k, shape, jnp.float32, -bound, bound)

    # conv1: torch weight (depth, in_c, 1, 1) -> stored (in_c, depth)
    w1 = unif(k1, (in_c, depth), in_c)
    b1 = unif(k2, (1, depth), in_c)
    # conv2: torch weight (depth, depth, K, K) -> stored HWIO (K, K, depth, depth)
    fan2 = depth * kernel_size * kernel_size
    w2 = unif(k3, (kernel_size, kernel_size, depth, depth), fan2)
    b2 = unif(k4, (1, depth), fan2)
    # conv3: torch weight (in_c, depth, 1, 1) -> stored (depth, in_c)
    w3 = unif(k5, (depth, in_c), depth)
    b3 = unif(k6, (1, in_c), depth)
    # BatchNorm2d default affine params: gamma = 1, beta = 0
    g1, be1 = jnp.ones((1, depth), jnp.float32), jnp.zeros((1, depth), jnp.float32)
    g2, be2 = jnp.ones((1, depth), jnp.float32), jnp.zeros((1, depth), jnp.float32)
    g3, be3 = jnp.ones((1, in_c), jnp.float32), jnp.zeros((1, in_c), jnp.float32)
    return (w1, b1, w2, b2, w3, b3, g1, be1, g2, be2, g3, be3)


if __name__ == "__main__":
    key = jax.random.PRNGKey(0)
    kx, kp = jax.random.split(key)

    N, C, H, W = 2, 8, 16, 16          # batch, in_c, spatial  (W*C = 128 lanes)
    kernel_size = 3
    bottleneck_depth = 16              # W*D = 256 lanes for inner activations

    x = jax.random.normal(kx, (N, C, H, W), dtype=jnp.float32)   # NCHW like PyTorch
    params = init_params(kp, C, kernel_size, bottleneck_depth)

    y = bottleneck_forward(x, params, kernel_size=kernel_size)
    jax.block_until_ready(y)
    assert y.shape == (N, C, H, W), y.shape
    assert bool(jnp.all(jnp.isfinite(y)))

    # Self-check against a pure-XLA reference of the same module semantics.
    y_ref = _reference_forward(x, params, kernel_size)
    max_err = float(jnp.max(jnp.abs(y - y_ref)))
    assert max_err < 5e-2, f"kernel/reference mismatch: max_err={max_err}"

    print("KERNEL_OK")
</pallas_src>

<mosaic_0001>
module attributes {stable_mosaic.version = 11 : i64} {
  func.func @_bottleneck_kernel(%arg0: memref<32x128xf32, #tpu.memory_space<vmem>>, %arg1: memref<128x256xf32, #tpu.memory_space<vmem>>, %arg2: memref<3x256x256xf32, #tpu.memory_space<vmem>>, %arg3: memref<256x128xf32, #tpu.memory_space<vmem>>, %arg4: memref<3x32x32xf32, #tpu.memory_space<vmem>>, %arg5: memref<1x768xf32, #tpu.memory_space<vmem>>, %arg6: memref<1x768xf32, #tpu.memory_space<vmem>>, %arg7: memref<1x384xf32, #tpu.memory_space<vmem>>, %arg8: memref<32x128xf32, #tpu.memory_space<vmem>>) attributes {dimension_semantics = [], scalar_prefetch = 0 : i64, scratch_operands = 0 : i64, tpu.core_type = #tpu.core_type<tc>} {
    %c0 = arith.constant 0 : index
    %c0_0 = arith.constant 0 : index
    %0 = vector.load %arg0[%c0, %c0_0] : memref<32x128xf32, #tpu.memory_space<vmem>>, vector<32x128xf32>
    %c0_1 = arith.constant 0 : index
    %c0_2 = arith.constant 0 : index
    %1 = vector.load %arg1[%c0_1, %c0_2] : memref<128x256xf32, #tpu.memory_space<vmem>>, vector<128x256xf32>
    %cst = arith.constant dense<0.000000e+00> : vector<32x256xf32>
    %2 = tpu.matmul %0, %1, %cst {dimension_numbers = #tpu.dot_dimension_numbers<[1], [0], [0], [1], [0, 0, 1, 1], [], []>} : vector<32x128xf32>, vector<128x256xf32>, vector<32x256xf32> -> vector<32x256xf32>
    %c0_3 = arith.constant 0 : index
    %c0_4 = arith.constant 0 : index
    %3 = vector.load %arg5[%c0_3, %c0_4] : memref<1x768xf32, #tpu.memory_space<vmem>>, vector<1x256xf32>
    %c0_5 = arith.constant 0 : index
    %c256 = arith.constant 256 : index
    %4 = vector.load %arg5[%c0_5, %c256] : memref<1x768xf32, #tpu.memory_space<vmem>>, vector<1x256xf32>
    %c0_6 = arith.constant 0 : index
    %c512 = arith.constant 512 : index
    %5 = vector.load %arg5[%c0_6, %c512] : memref<1x768xf32, #tpu.memory_space<vmem>>, vector<1x256xf32>
    %6 = vector.broadcast %3 : vector<1x256xf32> to vector<32x256xf32>
    %7 = arith.addf %2, %6 : vector<32x256xf32>
    %cst_7 = arith.constant 0.000000e+00 : f32
    %8 = vector.broadcast %cst_7 : f32 to vector<32x256xf32>
    %9 = arith.maximumf %7, %8 : vector<32x256xf32>
    %cst_8 = arith.constant dense<0.000000e+00> : vector<256xf32>
    %10 = vector.multi_reduction <add>, %9, %cst_8 [0] : vector<32x256xf32> to vector<256xf32>
    %11 = vector.shape_cast %10 : vector<256xf32> to vector<1x256xf32>
    %c16_i32 = arith.constant 16 : i32
    %12 = tpu.dynamic_rotate %11 by %c16_i32 dim 1 : vector<1x256xf32>, i32 -> vector<1x256xf32>
    %13 = arith.addf %11, %12 : vector<1x256xf32>
    %c32_i32 = arith.constant 32 : i32
    %14 = tpu.dynamic_rotate %13 by %c32_i32 dim 1 : vector<1x256xf32>, i32 -> vector<1x256xf32>
    %15 = arith.addf %13, %14 : vector<1x256xf32>
    %c64_i32 = arith.constant 64 : i32
    %16 = tpu.dynamic_rotate %15 by %c64_i32 dim 1 : vector<1x256xf32>, i32 -> vector<1x256xf32>
    %17 = arith.addf %15, %16 : vector<1x256xf32>
    %c128_i32 = arith.constant 128 : i32
    %18 = tpu.dynamic_rotate %17 by %c128_i32 dim 1 : vector<1x256xf32>, i32 -> vector<1x256xf32>
    %19 = arith.addf %17, %18 : vector<1x256xf32>
    %cst_9 = arith.constant 0.001953125 : f32
    %20 = vector.broadcast %cst_9 : f32 to vector<1x256xf32>
    %21 = arith.mulf %19, %20 : vector<1x256xf32>
    %22 = vector.broadcast %21 : vector<1x256xf32> to vector<32x256xf32>
    %23 = arith.subf %9, %22 : vector<32x256xf32>
    %24 = arith.mulf %23, %23 : vector<32x256xf32>
    %cst_10 = arith.constant dense<0.000000e+00> : vector<256xf32>
    %25 = vector.multi_reduction <add>, %24, %cst_10 [0] : vector<32x256xf32> to vector<256xf32>
    %26 = vector.shape_cast %25 : vector<256xf32> to vector<1x256xf32>
    %c16_i32_11 = arith.constant 16 : i32
    %27 = tpu.dynamic_rotate %26 by %c16_i32_11 dim 1 : vector<1x256xf32>, i32 -> vector<1x256xf32>
    %28 = arith.addf %26, %27 : vector<1x256xf32>
    %c32_i32_12 = arith.constant 32 : i32
    %29 = tpu.dynamic_rotate %28 by %c32_i32_12 dim 1 : vector<1x256xf32>, i32 -> vector<1x256xf32>
    %30 = arith.addf %28, %29 : vector<1x256xf32>
    %c64_i32_13 = arith.constant 64 : i32
    %31 = tpu.dynamic_rotate %30 by %c64_i32_13 dim 1 : vector<1x256xf32>, i32 -> vector<1x256xf32>
    %32 = arith.addf %30, %31 : vector<1x256xf32>
    %c128_i32_14 = arith.constant 128 : i32
    %33 = tpu.dynamic_rotate %32 by %c128_i32_14 dim 1 : vector<1x256xf32>, i32 -> vector<1x256xf32>
    %34 = arith.addf %32, %33 : vector<1x256xf32>
    %cst_15 = arith.constant 0.001953125 : f32
    %35 = vector.broadcast %cst_15 : f32 to vector<1x256xf32>
    %36 = arith.mulf %34, %35 : vector<1x256xf32>
    %cst_16 = arith.constant 9.99999974E-6 : f32
    %37 = vector.broadcast %cst_16 : f32 to vector<1x256xf32>
    %38 = arith.addf %36, %37 : vector<1x256xf32>
    %39 = math.rsqrt %38 : vector<1x256xf32>
    %40 = arith.mulf %4, %39 : vector<1x256xf32>
    %41 = vector.broadcast %40 : vector<1x256xf32> to vector<32x256xf32>
    %42 = arith.mulf %23, %41 : vector<32x256xf32>
    %43 = vector.broadcast %5 : vector<1x256xf32> to vector<32x256xf32>
    %44 = arith.addf %42, %43 : vector<32x256xf32>
    %c0_17 = arith.constant 0 : index
    %c0_18 = arith.constant 0 : index
    %c0_19 = arith.constant 0 : index
    %45 = vector.load %arg4[%c0_17, %c0_18, %c0_19] : memref<3x32x32xf32, #tpu.memory_space<vmem>>, vector<1x32x32xf32>
    %46 = vector.shape_cast %45 : vector<1x32x32xf32> to vector<32x32xf32>
    %cst_20 = arith.constant dense<0.000000e+00> : vector<32x256xf32>
    %47 = tpu.matmul %46, %44, %cst_20 {dimension_numbers = #tpu.dot_dimension_numbers<[1], [0], [0], [1], [0, 0, 1, 1], [], []>} : vector<32x32xf32>, vector<32x256xf32>, vector<32x256xf32> -> vector<32x256xf32>
    %c0_21 = arith.constant 0 : index
    %c0_22 = arith.constant 0 : index
    %c0_23 = arith.constant 0 : index
    %48 = vector.load %arg2[%c0_21, %c0_22, %c0_23] : memref<3x256x256xf32, #tpu.memory_space<vmem>>, vector<1x256x256xf32>
    %49 = vector.shape_cast %48 : vector<1x256x256xf32> to vector<256x256xf32>
    %cst_24 = arith.constant dense<0.000000e+00> : vector<32x256xf32>
    %50 = tpu.matmul %47, %49, %cst_24 {dimension_numbers = #tpu.dot_dimension_numbers<[1], [0], [0], [1], [0, 0, 1, 1], [], []>} : vector<32x256xf32>, vector<256x256xf32>, vector<32x256xf32> -> vector<32x256xf32>
    %c1 = arith.constant 1 : index
    %c0_25 = arith.constant 0 : index
    %c0_26 = arith.constant 0 : index
    %51 = vector.load %arg2[%c1, %c0_25, %c0_26] : memref<3x256x256xf32, #tpu.memory_space<vmem>>, vector<1x256x256xf32>
    %52 = vector.shape_cast %51 : vector<1x256x256xf32> to vector<256x256xf32>
    %cst_27 = arith.constant dense<0.000000e+00> : vector<32x256xf32>
    %53 = tpu.matmul %44, %52, %cst_27 {dimension_numbers = #tpu.dot_dimension_numbers<[1], [0], [0], [1], [0, 0, 1, 1], [], []>} : vector<32x256xf32>, vector<256x256xf32>, vector<32x256xf32> -> vector<32x256xf32>
    %54 = arith.addf %50, %53 : vector<32x256xf32>
    %c2 = arith.constant 2 : index
    %c0_28 = arith.constant 0 : index
    %c0_29 = arith.constant 0 : index
    %55 = vector.load %arg4[%c2, %c0_28, %c0_29] : memref<3x32x32xf32, #tpu.memory_space<vmem>>, vector<1x32x32xf32>
    %56 = vector.shape_cast %55 : vector<1x32x32xf32> to vector<32x32xf32>
    %cst_30 = arith.constant dense<0.000000e+00> : vector<32x256xf32>
    %57 = tpu.matmul %56, %44, %cst_30 {dimension_numbers = #tpu.dot_dimension_numbers<[1], [0], [0], [1], [0, 0, 1, 1], [], []>} : vector<32x32xf32>, vector<32x256xf32>, vector<32x256xf32> -> vector<32x256xf32>
    %c2_31 = arith.constant 2 : index
    %c0_32 = arith.constant 0 : index
    %c0_33 = arith.constant 0 : index
    %58 = vector.load %arg2[%c2_31, %c0_32, %c0_33] : memref<3x256x256xf32, #tpu.memory_space<vmem>>, vector<1x256x256xf32>
    %59 = vector.shape_cast %58 : vector<1x256x256xf32> to vector<256x256xf32>
    %cst_34 = arith.constant dense<0.000000e+00> : vector<32x256xf32>
    %60 = tpu.matmul %57, %59, %cst_34 {dimension_numbers = #tpu.dot_dimension_numbers<[1], [0], [0], [1], [0, 0, 1, 1], [], []>} : vector<32x256xf32>, vector<256x256xf32>, vector<32x256xf32> -> vector<32x256xf32>
    %61 = arith.addf %54, %60 : vector<32x256xf32>
    %c0_35 = arith.constant 0 : index
    %c0_36 = arith.constant 0 : index
    %62 = vector.load %arg6[%c0_35, %c0_36] : memref<1x768xf32, #tpu.memory_space<vmem>>, vector<1x256xf32>
    %c0_37 = arith.constant 0 : index
    %c256_38 = arith.constant 256 : index
    %63 = vector.load %arg6[%c0_37, %c256_38] : memref<1x768xf32, #tpu.memory_space<vmem>>, vector<1x256xf32>
    %c0_39 = arith.constant 0 : index
    %c512_40 = arith.constant 512 : index
    %64 = vector.load %arg6[%c0_39, %c512_40] : memref<1x768xf32, #tpu.memory_space<vmem>>, vector<1x256xf32>
    %65 = vector.broadcast %62 : vector<1x256xf32> to vector<32x256xf32>
    %66 = arith.addf %61, %65 : vector<32x256xf32>
    %cst_41 = arith.constant 0.000000e+00 : f32
    %67 = vector.broadcast %cst_41 : f32 to vector<32x256xf32>
    %68 = arith.maximumf %66, %67 : vector<32x256xf32>
    %cst_42 = arith.constant dense<0.000000e+00> : vector<256xf32>
    %69 = vector.multi_reduction <add>, %68, %cst_42 [0] : vector<32x256xf32> to vector<256xf32>
    %70 = vector.shape_cast %69 : vector<256xf32> to vector<1x256xf32>
    %c16_i32_43 = arith.constant 16 : i32
    %71 = tpu.dynamic_rotate %70 by %c16_i32_43 dim 1 : vector<1x256xf32>, i32 -> vector<1x256xf32>
    %72 = arith.addf %70, %71 : vector<1x256xf32>
    %c32_i32_44 = arith.constant 32 : i32
    %73 = tpu.dynamic_rotate %72 by %c32_i32_44 dim 1 : vector<1x256xf32>, i32 -> vector<1x256xf32>
    %74 = arith.addf %72, %73 : vector<1x256xf32>
    %c64_i32_45 = arith.constant 64 : i32
    %75 = tpu.dynamic_rotate %74 by %c64_i32_45 dim 1 : vector<1x256xf32>, i32 -> vector<1x256xf32>
    %76 = arith.addf %74, %75 : vector<1x256xf32>
    %c128_i32_46 = arith.constant 128 : i32
    %77 = tpu.dynamic_rotate %76 by %c128_i32_46 dim 1 : vector<1x256xf32>, i32 -> vector<1x256xf32>
    %78 = arith.addf %76, %77 : vector<1x256xf32>
    %cst_47 = arith.constant 0.001953125 : f32
    %79 = vector.broadcast %cst_47 : f32 to vector<1x256xf32>
    %80 = arith.mulf %78, %79 : vector<1x256xf32>
    %81 = vector.broadcast %80 : vector<1x256xf32> to vector<32x256xf32>
    %82 = arith.subf %68, %81 : vector<32x256xf32>
    %83 = arith.mulf %82, %82 : vector<32x256xf32>
    %cst_48 = arith.constant dense<0.000000e+00> : vector<256xf32>
    %84 = vector.multi_reduction <add>, %83, %cst_48 [0] : vector<32x256xf32> to vector<256xf32>
    %85 = vector.shape_cast %84 : vector<256xf32> to vector<1x256xf32>
    %c16_i32_49 = arith.constant 16 : i32
    %86 = tpu.dynamic_rotate %85 by %c16_i32_49 dim 1 : vector<1x256xf32>, i32 -> vector<1x256xf32>
    %87 = arith.addf %85, %86 : vector<1x256xf32>
    %c32_i32_50 = arith.constant 32 : i32
    %88 = tpu.dynamic_rotate %87 by %c32_i32_50 dim 1 : vector<1x256xf32>, i32 -> vector<1x256xf32>
    %89 = arith.addf %87, %88 : vector<1x256xf32>
    %c64_i32_51 = arith.constant 64 : i32
    %90 = tpu.dynamic_rotate %89 by %c64_i32_51 dim 1 : vector<1x256xf32>, i32 -> vector<1x256xf32>
    %91 = arith.addf %89, %90 : vector<1x256xf32>
    %c128_i32_52 = arith.constant 128 : i32
    %92 = tpu.dynamic_rotate %91 by %c128_i32_52 dim 1 : vector<1x256xf32>, i32 -> vector<1x256xf32>
    %93 = arith.addf %91, %92 : vector<1x256xf32>
    %cst_53 = arith.constant 0.001953125 : f32
    %94 = vector.broadcast %cst_53 : f32 to vector<1x256xf32>
    %95 = arith.mulf %93, %94 : vector<1x256xf32>
    %cst_54 = arith.constant 9.99999974E-6 : f32
    %96 = vector.broadcast %cst_54 : f32 to vector<1x256xf32>
    %97 = arith.addf %95, %96 : vector<1x256xf32>
    %98 = math.rsqrt %97 : vector<1x256xf32>
    %99 = arith.mulf %63, %98 : vector<1x256xf32>
    %100 = vector.broadcast %99 : vector<1x256xf32> to vector<32x256xf32>
    %101 = arith.mulf %82, %100 : vector<32x256xf32>
    %102 = vector.broadcast %64 : vector<1x256xf32> to vector<32x256xf32>
    %103 = arith.addf %101, %102 : vector<32x256xf32>
    %c0_55 = arith.constant 0 : index
    %c0_56 = arith.constant 0 : index
    %104 = vector.load %arg3[%c0_55, %c0_56] : memref<256x128xf32, #tpu.memory_space<vmem>>, vector<256x128xf32>
    %cst_57 = arith.constant dense<0.000000e+00> : vector<32x128xf32>
    %105 = tpu.matmul %103, %104, %cst_57 {dimension_numbers = #tpu.dot_dimension_numbers<[1], [0], [0], [1], [0, 0, 1, 1], [], []>} : vector<32x256xf32>, vector<256x128xf32>, vector<32x128xf32> -> vector<32x128xf32>
    %c0_58 = arith.constant 0 : index
    %c0_59 = arith.constant 0 : index
    %106 = vector.load %arg7[%c0_58, %c0_59] : memref<1x384xf32, #tpu.memory_space<vmem>>, vector<1x128xf32>
    %c0_60 = arith.constant 0 : index
    %c128 = arith.constant 128 : index
    %107 = vector.load %arg7[%c0_60, %c128] : memref<1x384xf32, #tpu.memory_space<vmem>>, vector<1x128xf32>
    %c0_61 = arith.constant 0 : index
    %c256_62 = arith.constant 256 : index
    %108 = vector.load %arg7[%c0_61, %c256_62] : memref<1x384xf32, #tpu.memory_space<vmem>>, vector<1x128xf32>
    %109 = vector.broadcast %106 : vector<1x128xf32> to vector<32x128xf32>
    %110 = arith.addf %105, %109 : vector<32x128xf32>
    %cst_63 = arith.constant 0.000000e+00 : f32
    %111 = vector.broadcast %cst_63 : f32 to vector<32x128xf32>
    %112 = arith.maximumf %110, %111 : vector<32x128xf32>
    %cst_64 = arith.constant dense<0.000000e+00> : vector<128xf32>
    %113 = vector.multi_reduction <add>, %112, %cst_64 [0] : vector<32x128xf32> to vector<128xf32>
    %114 = vector.shape_cast %113 : vector<128xf32> to vector<1x128xf32>
    %c8_i32 = arith.constant 8 : i32
    %115 = tpu.dynamic_rotate %114 by %c8_i32 dim 1 : vector<1x128xf32>, i32 -> vector<1x128xf32>
    %116 = arith.addf %114, %115 : vector<1x128xf32>
    %c16_i32_65 = arith.constant 16 : i32
    %117 = tpu.dynamic_rotate %116 by %c16_i32_65 dim 1 : vector<1x128xf32>, i32 -> vector<1x128xf32>
    %118 = arith.addf %116, %117 : vector<1x128xf32>
    %c32_i32_66 = arith.constant 32 : i32
    %119 = tpu.dynamic_rotate %118 by %c32_i32_66 dim 1 : vector<1x128xf32>, i32 -> vector<1x128xf32>
    %120 = arith.addf %118, %119 : vector<1x128xf32>
    %c64_i32_67 = arith.constant 64 : i32
    %121 = tpu.dynamic_rotate %120 by %c64_i32_67 dim 1 : vector<1x128xf32>, i32 -> vector<1x128xf32>
    %122 = arith.addf %120, %121 : vector<1x128xf32>
    %cst_68 = arith.constant 0.001953125 : f32
    %123 = vector.broadcast %cst_68 : f32 to vector<1x128xf32>
    %124 = arith.mulf %122, %123 : vector<1x128xf32>
    %125 = vector.broadcast %124 : vector<1x128xf32> to vector<32x128xf32>
    %126 = arith.subf %112, %125 : vector<32x128xf32>
    %127 = arith.mulf %126, %126 : vector<32x128xf32>
    %cst_69 = arith.constant dense<0.000000e+00> : vector<128xf32>
    %128 = vector.multi_reduction <add>, %127, %cst_69 [0] : vector<32x128xf32> to vector<128xf32>
    %129 = vector.shape_cast %128 : vector<128xf32> to vector<1x128xf32>
    %c8_i32_70 = arith.constant 8 : i32
    %130 = tpu.dynamic_rotate %129 by %c8_i32_70 dim 1 : vector<1x128xf32>, i32 -> vector<1x128xf32>
    %131 = arith.addf %129, %130 : vector<1x128xf32>
    %c16_i32_71 = arith.constant 16 : i32
    %132 = tpu.dynamic_rotate %131 by %c16_i32_71 dim 1 : vector<1x128xf32>, i32 -> vector<1x128xf32>
    %133 = arith.addf %131, %132 : vector<1x128xf32>
    %c32_i32_72 = arith.constant 32 : i32
    %134 = tpu.dynamic_rotate %133 by %c32_i32_72 dim 1 : vector<1x128xf32>, i32 -> vector<1x128xf32>
    %135 = arith.addf %133, %134 : vector<1x128xf32>
    %c64_i32_73 = arith.constant 64 : i32
    %136 = tpu.dynamic_rotate %135 by %c64_i32_73 dim 1 : vector<1x128xf32>, i32 -> vector<1x128xf32>
    %137 = arith.addf %135, %136 : vector<1x128xf32>
    %cst_74 = arith.constant 0.001953125 : f32
    %138 = vector.broadcast %cst_74 : f32 to vector<1x128xf32>
    %139 = arith.mulf %137, %138 : vector<1x128xf32>
    %cst_75 = arith.constant 9.99999974E-6 : f32
    %140 = vector.broadcast %cst_75 : f32 to vector<1x128xf32>
    %141 = arith.addf %139, %140 : vector<1x128xf32>
    %142 = math.rsqrt %141 : vector<1x128xf32>
    %143 = arith.mulf %107, %142 : vector<1x128xf32>
    %144 = vector.broadcast %143 : vector<1x128xf32> to vector<32x128xf32>
    %145 = arith.mulf %126, %144 : vector<32x128xf32>
    %146 = vector.broadcast %108 : vector<1x128xf32> to vector<32x128xf32>
    %147 = arith.addf %145, %146 : vector<32x128xf32>
    %c0_76 = arith.constant 0 : index
    %c0_77 = arith.constant 0 : index
    %148 = vector.load %arg8[%c0_76, %c0_77] : memref<32x128xf32, #tpu.memory_space<vmem>>, vector<32x128xf32>
    tpu.vector_store %arg8[%c0_76, %c0_77], %147 {strides = array<i32>} : memref<32x128xf32, #tpu.memory_space<vmem>>, vector<32x128xf32>,
    return
  }
}

</mosaic_0001>

<bundles_post_ra>
// kernel: bottleneck_forward.1
= control target key start
LH: loop header
LB: loop body
LE: loop exit
PB: predicated region body
PF: predicated region fallthrough
CT: control target
= control target key end

     0   :  { %v1927_v3 = vmov 0.0   ;;  %v69_v53 = vlaneseq  ;;  %s1929_s12 = smov 32   ;;  %s1930_s13 = smov 64   ;;  %vm351_vm3 = vcmask 261120   ;;  %s3146_s1 = inlined_call_operand.vmem [shape: f32[128,256], index: 1, kind: input, shape index: {}]   ;;  %s3147_s0 = inlined_call_operand.vmem [shape: f32[32,128], index: 0, kind: input, shape index: {}]   ;;  %s3148_s5 = inlined_call_operand.vmem [shape: f32[1,768], index: 5, kind: input, shape index: {}]   ;;  %s3149_s2 = inlined_call_operand.vmem [shape: f32[3,256,256], index: 2, kind: input, shape index: {}]   ;;  %s3150_s4 = inlined_call_operand.vmem [shape: f32[3,32,32], index: 4, kind: input, shape index: {}]   ;;  %s3151_s6 = inlined_call_operand.vmem [shape: f32[1,768], index: 6, kind: input, shape index: {}]   ;;  %s3152_s3 = inlined_call_operand.vmem [shape: f32[256,128], index: 3, kind: input, shape index: {}]   ;;  %s3153_s7 = inlined_call_operand.vmem [shape: f32[1,384], index: 7, kind: input, shape index: {}]   ;;  %s3154_s8 = inlined_call_operand.vmem [shape: f32[32,128], index: 8, kind: output, shape index: {}]  }
   0x1   :  { %v34_v0 = vld [vmem:[%s3146_s1 + $0x8] sm:$0xff]  ;;  %v36_v1 = vld [vmem:[%s3146_s1 + $0x18] sm:$0xff]  ;;  %v33_v2 = vld [vmem:[%s3146_s1] sm:$0xff]  ;;  %143 = vmatprep.mubr.f32.mxu0 %v1927_v3  ;;  %428 = vmatprep.mubr.f32.mxu1 %v1927_v3  ;;  %s1932_s17 = smov 8  }
   0x2   :  { %v1627_v4 = vpack.c.bf16 %v36_v1, %v34_v0  ;;  %v35_v5 = vld [vmem:[%s3146_s1 + $0x10] sm:$0xff]  ;;  %v38_v6 = vld [vmem:[%s3146_s1 + $0x28] sm:$0xff]  ;;  %v40_v7 = vld [vmem:[%s3146_s1 + $0x38] sm:$0xff]  ;;  %v2091_v54 = vshrl.u32 %v69_v53, 7 }
   0x3   :  { %v1629_v8 = vpack.c.bf16 %v35_v5, %v33_v2  ;;  %v1631_v9 = vpack.c.bf16 %v40_v7, %v38_v6  ;;  %v37_v10 = vld [vmem:[%s3146_s1 + $0x20] sm:$0xff]  ;;  %v39_v11 = vld [vmem:[%s3146_s1 + $0x30] sm:$0xff]  ;;  %v42_v12 = vld [vmem:[%s3146_s1 + $0x48] sm:$0xff] }
   0x4   :  { %1628 = vmatprep.subr.bf16.mxu0 %v1627_v4  ;;  %v44_v13 = vld [vmem:[%s3146_s1 + $0x58] sm:$0xff]  ;;  %v1633_v14 = vpack.c.bf16 %v39_v11, %v37_v10  ;;  %v41_v16 = vld [vmem:[%s3146_s1 + $0x40] sm:$0xff]  ;;  %v43_v17 = vld [vmem:[%s3146_s1 + $0x50] sm:$0xff]  ;;  %v2094_v55 = vsub.s32 0, %v2091_v54  ;;  %v2100_v58 = vsub.s32 1, %v2091_v54 }
   0x5   :  { %1630 = vmatpush1.bf16.msra.mxu0 %v1629_v8  ;;  %v1635_v15 = vpack.c.bf16 %v44_v13, %v42_v12  ;;  %v46_v18 = vld [vmem:[%s3146_s1 + $0x68] sm:$0xff]  ;;  %v48_v19 = vld [vmem:[%s3146_s1 + $0x78] sm:$0xff]  ;;  %v1637_v20 = vpack.c.bf16 %v43_v17, %v41_v16  ;;  %v45_v22 = vld [vmem:[%s3146_s1 + $0x60] sm:$0xff] }
   0x6   :  { %1632 = vmatprep.subr.bf16.mxu0 %v1631_v9  ;;  %v1639_v21 = vpack.c.bf16 %v48_v19, %v46_v18  ;;  %v47_v23 = vld [vmem:[%s3146_s1 + $0x70] sm:$0xff]  ;;  %v50_v24 = vld [vmem:[%s3146_s1 + $0x88] sm:$0xff]  ;;  %v52_v25 = vld [vmem:[%s3146_s1 + $0x98] sm:$0xff] }
   0x7   :  { %v1641_v26 = vpack.c.bf16 %v47_v23, %v45_v22  ;;  %v1643_v27 = vpack.c.bf16 %v52_v25, %v50_v24  ;;  %v49_v28 = vld [vmem:[%s3146_s1 + $0x80] sm:$0xff]  ;;  %v51_v29 = vld [vmem:[%s3146_s1 + $0x90] sm:$0xff]  ;;  %v54_v30 = vld [vmem:[%s3146_s1 + $0xa8] sm:$0xff] }
   0x8   :  { %v56_v31 = vld [vmem:[%s3146_s1 + $0xb8] sm:$0xff]  ;;  %v1645_v32 = vpack.c.bf16 %v51_v29, %v49_v28  ;;  %v53_v34 = vld [vmem:[%s3146_s1 + $0xa0] sm:$0xff]  ;;  %v55_v35 = vld [vmem:[%s3146_s1 + $0xb0] sm:$0xff] }
   0x9   :  { %1634 = vmatpush1.bf16.msra.mxu0 %v1633_v14  ;;  %v1647_v33 = vpack.c.bf16 %v56_v31, %v54_v30  ;;  %v58_v36 = vld [vmem:[%s3146_s1 + $0xc8] sm:$0xff]  ;;  %v60_v37 = vld [vmem:[%s3146_s1 + $0xd8] sm:$0xff]  ;;  %v1649_v38 = vpack.c.bf16 %v55_v35, %v53_v34  ;;  %v57_v40 = vld [vmem:[%s3146_s1 + $0xc0] sm:$0xff] }
   0xa   :  { %1636 = vmatprep.subr.bf16.mxu0 %v1635_v15  ;;  %v1651_v39 = vpack.c.bf16 %v60_v37, %v58_v36  ;;  %v59_v41 = vld [vmem:[%s3146_s1 + $0xd0] sm:$0xff]  ;;  %v62_v42 = vld [vmem:[%s3146_s1 + $0xe8] sm:$0xff]  ;;  %v64_v43 = vld [vmem:[%s3146_s1 + $0xf8] sm:$0xff] }
   0xb   :  { %v1653_v44 = vpack.c.bf16 %v59_v41, %v57_v40  ;;  %v1655_v45 = vpack.c.bf16 %v64_v43, %v62_v42  ;;  %v61_v46 = vld [vmem:[%s3146_s1 + $0xe0] sm:$0xff]  ;;  %v63_v47 = vld [vmem:[%s3146_s1 + $0xf0] sm:$0xff]  ;;  %v30_v50 = vld [vmem:[%s3147_s0 + $0x8] sm:$0xff] }
   0xc   :  { %v1657_v48 = vpack.c.bf16 %v63_v47, %v61_v46  ;;  %v29_v49 = vld [vmem:[%s3147_s0] sm:$0xff]  ;;  %v31_v51 = vld [vmem:[%s3147_s0 + $0x10] sm:$0xff]  ;;  %v32_v52 = vld [vmem:[%s3147_s0 + $0x18] sm:$0xff]  ;;  %s1928_s0 = smov 16  }
   0xd   :  { %1638 = vmatpush1.bf16.msra.mxu0 %v1637_v20  ;;  %v65_v56 = vld [vmem:[%s3148_s5] sm:$0x3] }
   0xe   :  { %1640 = vmatprep.subr.bf16.mxu0 %v1639_v21  ;;  %v72_v60 = vrot.slane %v65_v56, %v2094_v55  ;;  %v76_v61 = vrot.slane %v65_v56, %v2100_v58 }
  0x11   :  { %1642 = vmatpush1.bf16.msra.mxu0 %v1641_v26 }
  0x12   :  { %1644 = vmatprep.subr.bf16.mxu0 %v1643_v27 }
  0x15   :  { %1646 = vmatpush1.bf16.msra.mxu0 %v1645_v32 }
  0x16   :  { %1648 = vmatprep.subr.bf16.mxu0 %v1647_v33 }
  0x19   :  { %1650 = vmatpush1.bf16.msra.mxu0 %v1649_v38 }
  0x1a   :  { %1652 = vmatprep.subr.bf16.mxu0 %v1651_v39  ;;  %v2135_v39 = vand.u32 127, %v69_v53 }
  0x1c   :  { %vm200_vm0 = vcmp.lt.s32.totalorder %v2135_v39, 16  ;;  %vm209_vm1 = vcmp.lt.s32.totalorder %v2135_v39, 32  ;;  %vm218_vm2 = vcmp.lt.s32.totalorder %v2135_v39, 64  ;;  %v1030_v39 = vld [vmem:[%s3151_s6 + $0x4] sm:$0x3] }
  0x1d   :  { %1654 = vmatpush1.bf16.msra.mxu0 %v1653_v44 }
  0x1e   :  { %1656 = vmatprep.subr.bf16.mxu0 %v1655_v45 }
  0x21   :  { %1658 = vmatpush1.bf16.msra.mxu0 %v1657_v48 }
  0x24   :  { %144 = vmatmul.mubr.f32.vlgmr.msra.gmra.mrb[0].mxu0 %v29_v49 }
  0x25   :  { %149 = vmatprep.mubr.f32.mxu0 %v1927_v3 }
  0x28   :  { %150 = vmatmul.mubr.f32.gmra.mrb[2].mxu0 %v30_v50 }
  0x29   :  { %155 = vmatprep.mubr.f32.mxu0 %v1927_v3 }
  0x2c   :  { %156 = vmatmul.mubr.f32.gmra.mrb[4].mxu0 %v31_v51 }
  0x2d   :  { %161 = vmatprep.mubr.f32.mxu0 %v1927_v3 }
  0x30   :  { %162 = vmatmul.mubr.f32.gmra.mrb[6].mxu0 %v32_v52 }
  0xf7   :  { %v145_v57 = vpop.f32.mrb[0].mxu0 }
  0xf8   :  { %v147_v59 = vpop.f32.mrb[1].mxu0  ;;  %v2108_v2 = vadd.f32 %v145_v57, %v72_v60 }
  0xf9   :  { %v2110_v4 = vadd.f32 %v147_v59, %v76_v61 }
  0xfa   :  { %v168_v11 = vmax.f32 %v2108_v2, 0.0 }
  0xfb   :  { %v151_v62 = vpop.f32.mrb[2].mxu0  ;;  %v169_v13 = vmax.f32 %v2110_v4, 0.0 }
  0xfc   :  { %v2104_v63 = vadd.f32 %v151_v62, %v72_v60  ;;  %v153_v0 = vpop.f32.mrb[3].mxu0 }
  0xfd   :  { %v2106_v1 = vadd.f32 %v153_v0, %v76_v61 }
  0xfe   :  { %v170_v6 = vmax.f32 %v2104_v63, 0.0 }
  0xff   :  { %v157_v5 = vpop.f32.mrb[4].mxu0  ;;  %v171_v9 = vmax.f32 %v2106_v1, 0.0 }
 0x100   :  { %v2113_v7 = vadd.f32 %v157_v5, %v72_v60  ;;  %v159_v8 = vpop.f32.mrb[5].mxu0  ;;  %v176_v16 = vadd.f32 %v170_v6, %v168_v11 }
 0x101   :  { %v2116_v10 = vadd.f32 %v159_v8, %v76_v61  ;;  %v185_v19 = vadd.f32 %v171_v9, %v169_v13 }
 0x102   :  { %v172_v12 = vmax.f32 %v2113_v7, 0.0 }
 0x103   :  { %v173_v14 = vmax.f32 %v2116_v10, 0.0  ;;  %v163_v15 = vpop.f32.mrb[6].mxu0 }
 0x104   :  { %v2126_v17 = vadd.f32 %v163_v15, %v72_v60  ;;  %v165_v18 = vpop.f32.mrb[7].mxu0  ;;  %v177_v21 = vadd.f32 %v176_v16, %v172_v12 }
 0x105   :  { %v166_v20 = vadd.f32 %v165_v18, %v76_v61  ;;  %v186_v23 = vadd.f32 %v185_v19, %v173_v14 }
 0x106   :  { %v174_v22 = vmax.f32 %v2126_v17, 0.0 }
 0x107   :  { %v175_v24 = vmax.f32 %v166_v20, 0.0 }
 0x108   :  { %v178_v25 = vadd.f32 %v177_v21, %v174_v22 }
 0x109   :  { %v187_v26 = vadd.f32 %v186_v23, %v175_v24 }
 0x10a   :  { %v179_v27 = vrot.slane %v178_v25, 4 }
 0x10b   :  { %v188_v28 = vrot.slane %v187_v26, 4 }
 0x10c   :  { %v180_v29 = vadd.f32 %v179_v27, %v178_v25 }
 0x10d   :  { %v189_v30 = vadd.f32 %v188_v28, %v187_v26 }
 0x10e   :  { %v181_v31 = vrot.slane %v180_v29, 2 }
 0x10f   :  { %v190_v32 = vrot.slane %v189_v30, 2 }
 0x110   :  { %v182_v33 = vadd.f32 %v181_v31, %v180_v29 }
 0x111   :  { %v191_v34 = vadd.f32 %v190_v32, %v189_v30 }
 0x112   :  { %v183_v35 = vrot.slane %v182_v33, 1 }
 0x113   :  { %v192_v37 = vrot.slane %v191_v34, 1 }
 0x114   :  { %v184_v36 = vadd.f32 %v183_v35, %v182_v33  ;;  %v1446_v35 = vld [vmem:[%s3149_s2 + $0x208] sm:$0xff] }
 0x115   :  { %v193_v38 = vadd.f32 %v192_v37, %v191_v34  ;;  %v1445_v37 = vld [vmem:[%s3149_s2 + $0x200] sm:$0xff] }
 0x116   :  { %194 = vrot.lane.b32.xlu0 %v184_v36, %s1928_s0 }
 0x11a   :  { %196 = vrot.lane.b32.xlu0 %v193_v38, %s1928_s0 }
 0x188   :  { %v195_v40 = vpop.permute.xlu0 %194 }
 0x18c   :  { %v197_v41 = vpop.permute.xlu0 %196 }
 0x18d   :  { %v202_v42 = vsel %vm200_vm0, %v197_v41, %v195_v40  ;;  %v201_v44 = vsel %vm200_vm0, %v195_v40, %v197_v41  ;;  %v1447_v40 = vld [vmem:[%s3149_s2 + $0x210] sm:$0xff]  ;;  %v1450_v41 = vld [vmem:[%s3149_s2 + $0x228] sm:$0xff] }
 0x18e   :  { %v203_v43 = vadd.f32 %v202_v42, %v184_v36  ;;  %v204_v45 = vadd.f32 %v201_v44, %v193_v38  ;;  %v1448_v36 = vld [vmem:[%s3149_s2 + $0x218] sm:$0xff] }
 0x18f   :  { %v1667_v38 = vpack.c.bf16 %v1448_v36, %v1446_v35  ;;  %v1452_v42 = vld [vmem:[%s3149_s2 + $0x238] sm:$0xff]  ;;  %v1473_v35 = vld [vmem:[%s3149_s2 + $0x2e0] sm:$0xff]  ;;  %v1475_v36 = vld [vmem:[%s3149_s2 + $0x2f0] sm:$0xff] }
 0x190   :  { %205 = vrot.lane.b32.xlu1 %v203_v43, %s1929_s12  ;;  %v1671_v44 = vpack.c.bf16 %v1452_v42, %v1450_v41  ;;  %v1477_v42 = vld [vmem:[%s3149_s2 + $0x300] sm:$0xff] }
 0x191   :  { %1668 = vmatprep.subr.bf16.mxu0 %v1667_v38  ;;  %v1478_v38 = vld [vmem:[%s3149_s2 + $0x308] sm:$0xff] }
 0x194   :  { %207 = vrot.lane.b32.xlu1 %v204_v45, %s1929_s12 }
 0x202   :  { %v206_v46 = vpop.permute.xlu1 %205 }
 0x206   :  { %v208_v47 = vpop.permute.xlu1 %207 }
 0x207   :  { %v210_v48 = vsel %vm209_vm1, %v206_v46, %v208_v47  ;;  %v211_v49 = vsel %vm209_vm1, %v208_v47, %v206_v46  ;;  %v1451_v46 = vld [vmem:[%s3149_s2 + $0x230] sm:$0xff]  ;;  %v1454_v47 = vld [vmem:[%s3149_s2 + $0x248] sm:$0xff] }
 0x208   :  { %v212_v50 = vadd.f32 %v211_v49, %v203_v43  ;;  %v213_v51 = vadd.f32 %v210_v48, %v204_v45  ;;  %v1669_v43 = vpack.c.bf16 %v1447_v40, %v1445_v37  ;;  %v1449_v45 = vld [vmem:[%s3149_s2 + $0x220] sm:$0xff]  ;;  %v1456_v48 = vld [vmem:[%s3149_s2 + $0x258] sm:$0xff]  ;;  %v1697_v37 = vpack.c.bf16 %v1475_v36, %v1473_v35  ;;  %v1506_v35 = vld [vmem:[%s3149_s2 + $0x3e8] sm:$0xff] }
 0x209   :  { %v1480_v40 = vld [vmem:[%s3149_s2 + $0x318] sm:$0xff] }
 0x20a   :  { %214 = vrot.lane.b32.xlu0 %v212_v50, %s1930_s13  ;;  %216 = vrot.lane.b32.xlu1 %v213_v51, %s1930_s13  ;;  %v1699_v41 = vpack.c.bf16 %v1480_v40, %v1478_v38  ;;  %v1508_v36 = vld [vmem:[%s3149_s2 + $0x3f8] sm:$0xff]  ;;  %v1507_v40 = vld [vmem:[%s3149_s2 + $0x3f0] sm:$0xff] }
 0x20b   :  { %1670 = vmatpush1.bf16.msra.mxu0 %v1669_v43  ;;  %v1479_v43 = vld [vmem:[%s3149_s2 + $0x310] sm:$0xff]  ;;  %v1727_v38 = vpack.c.bf16 %v1508_v36, %v1506_v35  ;;  %v457_v35 = vld [vmem:[%s3149_s2 + $0x20] sm:$0xff] }
 0x20c   :  { %1672 = vmatprep.subr.bf16.mxu0 %v1671_v44  ;;  %v1701_v44 = vpack.c.bf16 %v1479_v43, %v1477_v42  ;;  %v459_v36 = vld [vmem:[%s3149_s2 + $0x30] sm:$0xff] }
 0x27c   :  { %v215_v52 = vpop.permute.xlu0 %214  ;;  %v217_v53 = vpop.permute.xlu1 %216 }
 0x27d   :  { %v219_v56 = vsel %vm218_vm2, %v215_v52, %v217_v53  ;;  %v220_v57 = vsel %vm218_vm2, %v217_v53, %v215_v52  ;;  %v1453_v52 = vld [vmem:[%s3149_s2 + $0x240] sm:$0xff]  ;;  %v1455_v53 = vld [vmem:[%s3149_s2 + $0x250] sm:$0xff] }
 0x27e   :  { %v221_v59 = vadd.f32 %v220_v57, %v212_v50  ;;  %v222_v60 = vadd.f32 %v219_v56, %v213_v51  ;;  %v1673_v50 = vpack.c.bf16 %v1451_v46, %v1449_v45  ;;  %v1482_v45 = vld [vmem:[%s3149_s2 + $0x328] sm:$0xff]  ;;  %v1484_v46 = vld [vmem:[%s3149_s2 + $0x338] sm:$0xff] }
 0x280   :  { %v223_v61 = vadd.f32 %v222_v60, %v221_v59  ;;  %v1675_v59 = vpack.c.bf16 %v1456_v48, %v1454_v47  ;;  %v1458_v60 = vld [vmem:[%s3149_s2 + $0x268] sm:$0xff]  ;;  %1674 = vmatpush1.bf16.msra.mxu0 %v1673_v50  ;;  %v1703_v47 = vpack.c.bf16 %v1484_v46, %v1482_v45  ;;  %v1481_v48 = vld [vmem:[%s3149_s2 + $0x320] sm:$0xff] }
 0x282   :  { %v224_v62 = vmul.f32 0.001953125, %v223_v61  ;;  %v1460_v61 = vld [vmem:[%s3149_s2 + $0x278] sm:$0xff]  ;;  %1676 = vmatprep.subr.bf16.mxu0 %v1675_v59  ;;  %v1485_v59 = vld [vmem:[%s3149_s2 + $0x340] sm:$0xff] }
 0x284   :  { %v228_v0 = vrot.slane %v224_v62, %v2094_v55 }
 0x286   :  { %v2157_v4 = vsub.f32 %v169_v13, %v228_v0  ;;  %v2161_v5 = vsub.f32 %v171_v9, %v228_v0  ;;  %v2163_v8 = vsub.f32 %v173_v14, %v228_v0  ;;  %v2167_v10 = vsub.f32 %v168_v11, %v228_v0 }
 0x287   :  { %v2171_v15 = vsub.f32 %v170_v6, %v228_v0  ;;  %v2175_v16 = vsub.f32 %v172_v12, %v228_v0  ;;  %v2177_v13 = vsub.f32 %v175_v24, %v228_v0  ;;  %v2183_v14 = vsub.f32 %v174_v22, %v228_v0 }
 0x288   :  { %v238_v1 = vmul.f32 %v2157_v4, %v2157_v4  ;;  %v240_v9 = vmul.f32 %v2161_v5, %v2161_v5  ;;  %v237_v2 = vmul.f32 %v2167_v10, %v2167_v10  ;;  %v242_v6 = vmul.f32 %v2163_v8, %v2163_v8 }
 0x289   :  { %v239_v63 = vmul.f32 %v2171_v15, %v2171_v15  ;;  %v241_v11 = vmul.f32 %v2175_v16, %v2175_v16  ;;  %v244_v17 = vmul.f32 %v2177_v13, %v2177_v13  ;;  %v243_v19 = vmul.f32 %v2183_v14, %v2183_v14 }
 0x28a   :  { %v254_v7 = vadd.f32 %v240_v9, %v238_v1  ;;  %v1677_v1 = vpack.c.bf16 %v1455_v53, %v1453_v52  ;;  %v1679_v9 = vpack.c.bf16 %v1460_v61, %v1458_v60  ;;  %v1488_v52 = vld [vmem:[%s3149_s2 + $0x358] sm:$0xff]  ;;  %v1487_v60 = vld [vmem:[%s3149_s2 + $0x350] sm:$0xff] }
 0x28b   :  { %v245_v12 = vadd.f32 %v239_v63, %v237_v2  ;;  %v1457_v2 = vld [vmem:[%s3149_s2 + $0x260] sm:$0xff]  ;;  %v1459_v63 = vld [vmem:[%s3149_s2 + $0x270] sm:$0xff] }
 0x28c   :  { %v255_v18 = vadd.f32 %v254_v7, %v242_v6  ;;  %v1462_v6 = vld [vmem:[%s3149_s2 + $0x288] sm:$0xff]  ;;  %v1464_v7 = vld [vmem:[%s3149_s2 + $0x298] sm:$0xff]  ;;  %1678 = vmatpush1.bf16.msra.mxu0 %v1677_v1 }
 0x28d   :  { %v246_v20 = vadd.f32 %v245_v12, %v241_v11  ;;  %v1681_v11 = vpack.c.bf16 %v1459_v63, %v1457_v2  ;;  %1680 = vmatprep.subr.bf16.mxu0 %v1679_v9  ;;  %v1683_v12 = vpack.c.bf16 %v1464_v7, %v1462_v6  ;;  %v1709_v9 = vpack.c.bf16 %v1487_v60, %v1485_v59  ;;  %v1490_v6 = vld [vmem:[%s3149_s2 + $0x368] sm:$0xff]  ;;  %v1492_v7 = vld [vmem:[%s3149_s2 + $0x378] sm:$0xff] }
 0x28e   :  { %v256_v21 = vadd.f32 %v255_v18, %v244_v17  ;;  %v1461_v17 = vld [vmem:[%s3149_s2 + $0x280] sm:$0xff]  ;;  %v1463_v18 = vld [vmem:[%s3149_s2 + $0x290] sm:$0xff] }
 0x28f   :  { %v247_v22 = vadd.f32 %v246_v20, %v243_v19  ;;  %v1466_v19 = vld [vmem:[%s3149_s2 + $0x2a8] sm:$0xff]  ;;  %v1468_v20 = vld [vmem:[%s3149_s2 + $0x2b8] sm:$0xff] }
 0x290   :  { %v257_v23 = vrot.slane %v256_v21, 4  ;;  %1682 = vmatpush1.bf16.msra.mxu0 %v1681_v11  ;;  %v1711_v11 = vpack.c.bf16 %v1492_v7, %v1490_v6 }
 0x291   :  { %v248_v24 = vrot.slane %v247_v22, 4  ;;  %1684 = vmatprep.subr.bf16.mxu0 %v1683_v12 }
 0x292   :  { %v258_v25 = vadd.f32 %v257_v23, %v256_v21  ;;  %v1685_v21 = vpack.c.bf16 %v1463_v18, %v1461_v17  ;;  %v1465_v23 = vld [vmem:[%s3149_s2 + $0x2a0] sm:$0xff]  ;;  %v1494_v17 = vld [vmem:[%s3149_s2 + $0x388] sm:$0xff]  ;;  %v1496_v18 = vld [vmem:[%s3149_s2 + $0x398] sm:$0xff] }
 0x293   :  { %v249_v26 = vadd.f32 %v248_v24, %v247_v22  ;;  %v1687_v22 = vpack.c.bf16 %v1468_v20, %v1466_v19  ;;  %v1467_v24 = vld [vmem:[%s3149_s2 + $0x2b0] sm:$0xff]  ;;  %v1715_v19 = vpack.c.bf16 %v1496_v18, %v1494_v17  ;;  %v1493_v20 = vld [vmem:[%s3149_s2 + $0x380] sm:$0xff] }
 0x294   :  { %v259_v27 = vrot.slane %v258_v25, 2  ;;  %1686 = vmatpush1.bf16.msra.mxu0 %v1685_v21  ;;  %v1495_v21 = vld [vmem:[%s3149_s2 + $0x390] sm:$0xff] }
 0x295   :  { %v250_v28 = vrot.slane %v249_v26, 2  ;;  %1688 = vmatprep.subr.bf16.mxu0 %v1687_v22  ;;  %v1717_v22 = vpack.c.bf16 %v1495_v21, %v1493_v20 }
 0x296   :  { %v260_v29 = vadd.f32 %v259_v27, %v258_v25  ;;  %v1470_v25 = vld [vmem:[%s3149_s2 + $0x2c8] sm:$0xff]  ;;  %v1689_v27 = vpack.c.bf16 %v1467_v24, %v1465_v23  ;;  %v1500_v24 = vld [vmem:[%s3149_s2 + $0x3b8] sm:$0xff] }
 0x297   :  { %v251_v30 = vadd.f32 %v250_v28, %v249_v26  ;;  %v1472_v26 = vld [vmem:[%s3149_s2 + $0x2d8] sm:$0xff]  ;;  %v1498_v23 = vld [vmem:[%s3149_s2 + $0x3a8] sm:$0xff] }
 0x298   :  { %v261_v31 = vrot.slane %v260_v29, 1  ;;  %v1691_v28 = vpack.c.bf16 %v1472_v26, %v1470_v25  ;;  %1690 = vmatpush1.bf16.msra.mxu0 %v1689_v27  ;;  %v1719_v25 = vpack.c.bf16 %v1500_v24, %v1498_v23  ;;  %v1497_v26 = vld [vmem:[%s3149_s2 + $0x3a0] sm:$0xff]  ;;  %v1499_v27 = vld [vmem:[%s3149_s2 + $0x3b0] sm:$0xff] }
 0x299   :  { %v252_v32 = vrot.slane %v251_v30, 1 }
 0x29a   :  { %v262_v33 = vadd.f32 %v261_v31, %v260_v29  ;;  %v1469_v29 = vld [vmem:[%s3149_s2 + $0x2c0] sm:$0xff]  ;;  %v1474_v31 = vld [vmem:[%s3149_s2 + $0x2e8] sm:$0xff]  ;;  %1692 = vmatprep.subr.bf16.mxu0 %v1691_v28  ;;  %v1721_v28 = vpack.c.bf16 %v1499_v27, %v1497_v26 }
 0x29b   :  { %v253_v34 = vadd.f32 %v252_v32, %v251_v30  ;;  %v1471_v30 = vld [vmem:[%s3149_s2 + $0x2d0] sm:$0xff]  ;;  %v1476_v32 = vld [vmem:[%s3149_s2 + $0x2f8] sm:$0xff]  ;;  %v453_v27 = vld [vmem:[%s3149_s2] sm:$0xff] }
 0x29c   :  { %265 = vrot.lane.b32.xlu1 %v262_v33, %s1928_s0 }
 0x29d   :  { %263 = vrot.lane.b32.xlu0 %v253_v34, %s1928_s0 }
 0x30e   :  { %v266_v49 = vpop.permute.xlu1 %265 }
 0x30f   :  { %v264_v51 = vpop.permute.xlu0 %263 }
 0x310   :  { %v267_v56 = vsel %vm200_vm0, %v264_v51, %v266_v49  ;;  %v268_v57 = vsel %vm200_vm0, %v266_v49, %v264_v51  ;;  %v1483_v49 = vld [vmem:[%s3149_s2 + $0x330] sm:$0xff]  ;;  %v1486_v51 = vld [vmem:[%s3149_s2 + $0x348] sm:$0xff] }
 0x311   :  { %v2245_v62 = vadd.f32 %v268_v57, %v253_v34  ;;  %v2247_v0 = vadd.f32 %v267_v56, %v262_v33  ;;  %v1693_v33 = vpack.c.bf16 %v1471_v30, %v1469_v29  ;;  %v1695_v34 = vpack.c.bf16 %v1476_v32, %v1474_v31  ;;  %v1502_v29 = vld [vmem:[%s3149_s2 + $0x3c8] sm:$0xff]  ;;  %v1504_v30 = vld [vmem:[%s3149_s2 + $0x3d8] sm:$0xff]  ;;  %v1501_v32 = vld [vmem:[%s3149_s2 + $0x3c0] sm:$0xff] }
 0x312   :  { %v1705_v50 = vpack.c.bf16 %v1483_v49, %v1481_v48  ;;  %v1707_v57 = vpack.c.bf16 %v1488_v52, %v1486_v51  ;;  %v1723_v31 = vpack.c.bf16 %v1504_v30, %v1502_v29  ;;  %v1931_v51 = vmov 1966171168   ;;  %v458_v30 = vld [vmem:[%s3149_s2 + $0x28] sm:$0xff] }
 0x313   :  { %271 = vrot.lane.b32.xlu0 %v2245_v62, %s1929_s12  ;;  %273 = vrot.lane.b32.xlu1 %v2247_v0, %s1929_s12  ;;  %v294_v52 = vunpack.c.l.s4 %v1931_v51  ;;  %v465_v51 = vld [vmem:[%s3149_s2 + $0x60] sm:$0xff] }
 0x314   :  { %1694 = vmatpush1.bf16.msra.mxu0 %v1693_v33  ;;  %v1503_v33 = vld [vmem:[%s3149_s2 + $0x3d0] sm:$0xff] }
 0x315   :  { %1696 = vmatprep.subr.bf16.mxu0 %v1695_v34  ;;  %v1725_v34 = vpack.c.bf16 %v1503_v33, %v1501_v32  ;;  %v347_v32 = vld [vmem:[%s3150_s4] sm:$0xff] }
 0x318   :  { %1698 = vmatpush1.bf16.msra.mxu0 %v1697_v37  ;;  %v1505_v37 = vld [vmem:[%s3149_s2 + $0x3e0] sm:$0xff] }
 0x319   :  { %1700 = vmatprep.subr.bf16.mxu0 %v1699_v41  ;;  %v1729_v41 = vpack.c.bf16 %v1507_v40, %v1505_v37  ;;  %v462_v37 = vld [vmem:[%s3149_s2 + $0x48] sm:$0xff] }
 0x31a   :  { %v348_v40 = vld [vmem:[%s3150_s4 + $0x8] sm:$0xff] }
 0x31c   :  { %1702 = vmatpush1.bf16.msra.mxu0 %v1701_v44 }
 0x31d   :  { %1704 = vmatprep.subr.bf16.mxu0 %v1703_v47 }
 0x320   :  { %1706 = vmatpush1.bf16.msra.mxu0 %v1705_v50 }
 0x321   :  { %1708 = vmatprep.subr.bf16.mxu0 %v1707_v57 }
 0x324   :  { %1710 = vmatpush1.bf16.msra.mxu0 %v1709_v9  ;;  %v67_v9 = vld [vmem:[%s3148_s5 + $0x4] sm:$0x3] }
 0x325   :  { %1712 = vmatprep.subr.bf16.mxu0 %v1711_v11  ;;  %v332_v6 = vrot.slane %v67_v9, %v2094_v55  ;;  %v336_v7 = vrot.slane %v67_v9, %v2100_v58  ;;  %v469_v9 = vld [vmem:[%s3149_s2 + $0x80] sm:$0xff] }
 0x385   :  { %v272_v53 = vpop.permute.xlu0 %271  ;;  %v274_v56 = vpop.permute.xlu1 %273 }
 0x386   :  { %v275_v61 = vsel %vm209_vm1, %v272_v53, %v274_v56  ;;  %v276_v1 = vsel %vm209_vm1, %v274_v56, %v272_v53  ;;  %v295_v53 = vunpack.c.0.s8 %v294_v52  ;;  %v467_v52 = vld [vmem:[%s3149_s2 + $0x70] sm:$0xff] }
 0x387   :  { %v277_v2 = vadd.f32 %v276_v1, %v2245_v62  ;;  %v278_v63 = vadd.f32 %v275_v61, %v2247_v0  ;;  %v1489_v62 = vld [vmem:[%s3149_s2 + $0x360] sm:$0xff]  ;;  %v1491_v0 = vld [vmem:[%s3149_s2 + $0x370] sm:$0xff] }
 0x388   :  { %v1713_v12 = vpack.c.bf16 %v1491_v0, %v1489_v62  ;;  %v2416_v56 = vsub.s32 %v295_v53, %v2091_v54  ;;  %v66_v61 = vld [vmem:[%s3148_s5 + $0x2] sm:$0x3]  ;;  %v470_v53 = vld [vmem:[%s3149_s2 + $0x88] sm:$0xff] }
 0x389   :  { %279 = vrot.lane.b32.xlu0 %v277_v2, %s1930_s13  ;;  %281 = vrot.lane.b32.xlu1 %v278_v63, %s1930_s13 }
 0x38a   :  { %1714 = vmatpush1.bf16.msra.mxu0 %v1713_v12 }
 0x38b   :  { %1716 = vmatprep.subr.bf16.mxu0 %v1715_v19 }
 0x38e   :  { %1718 = vmatpush1.bf16.msra.mxu0 %v1717_v22 }
 0x38f   :  { %1720 = vmatprep.subr.bf16.mxu0 %v1719_v25 }
 0x392   :  { %1722 = vmatpush1.bf16.msra.mxu0 %v1721_v28  ;;  %v455_v28 = vld [vmem:[%s3149_s2 + $0x10] sm:$0xff] }
 0x393   :  { %1724 = vmatprep.subr.bf16.mxu0 %v1723_v31  ;;  %v460_v31 = vld [vmem:[%s3149_s2 + $0x38] sm:$0xff]  ;;  %v1733_v33 = vpack.c.bf16 %v455_v28, %v453_v27 }
 0x394   :  { %v492_v27 = vld [vmem:[%s3149_s2 + $0x138] sm:$0xff] }
 0x396   :  { %1726 = vmatpush1.bf16.msra.mxu0 %v1725_v34  ;;  %v1735_v34 = vpack.c.bf16 %v460_v31, %v458_v30  ;;  %v489_v30 = vld [vmem:[%s3149_s2 + $0x120] sm:$0xff]  ;;  %v491_v31 = vld [vmem:[%s3149_s2 + $0x130] sm:$0xff] }
 0x397   :  { %1728 = vmatprep.subr.bf16.mxu0 %v1727_v38  ;;  %v464_v38 = vld [vmem:[%s3149_s2 + $0x58] sm:$0xff] }
 0x39a   :  { %1730 = vmatpush1.bf16.msra.mxu0 %v1729_v41  ;;  %v1737_v41 = vpack.c.bf16 %v459_v36, %v457_v35  ;;  %v493_v36 = vld [vmem:[%s3149_s2 + $0x140] sm:$0xff] }
 0x3fb   :  { %v280_v42 = vpop.permute.xlu0 %279  ;;  %v282_v43 = vpop.permute.xlu1 %281 }
 0x3fc   :  { %v283_v44 = vsel %vm218_vm2, %v280_v42, %v282_v43  ;;  %v284_v45 = vsel %vm218_vm2, %v282_v43, %v280_v42  ;;  %v1739_v42 = vpack.c.bf16 %v464_v38, %v462_v37  ;;  %v461_v43 = vld [vmem:[%s3149_s2 + $0x40] sm:$0xff]  ;;  %v495_v37 = vld [vmem:[%s3149_s2 + $0x150] sm:$0xff]  ;;  %v498_v38 = vld [vmem:[%s3149_s2 + $0x168] sm:$0xff] }
 0x3fd   :  { %v285_v46 = vadd.f32 %v284_v45, %v277_v2  ;;  %v286_v47 = vadd.f32 %v283_v44, %v278_v63  ;;  %v463_v44 = vld [vmem:[%s3149_s2 + $0x50] sm:$0xff]  ;;  %v466_v45 = vld [vmem:[%s3149_s2 + $0x68] sm:$0xff] }
 0x3ff   :  { %v287_v48 = vadd.f32 %v286_v47, %v285_v46  ;;  %v468_v46 = vld [vmem:[%s3149_s2 + $0x78] sm:$0xff]  ;;  %v1509_v47 = vld [vmem:[%s3150_s4 + $0x40] sm:$0xff] }
 0x401   :  { %v288_v49 = vmul.f32 0.001953125, %v287_v48  ;;  %v349_v48 = vld [vmem:[%s3150_s4 + $0x10] sm:$0xff] }
 0x403   :  { %v289_v50 = vadd.f32 1e-05, %v288_v49  ;;  %v1741_v49 = vpack.c.bf16 %v463_v44, %v461_v43  ;;  %v497_v43 = vld [vmem:[%s3149_s2 + $0x160] sm:$0xff]  ;;  %v499_v44 = vld [vmem:[%s3149_s2 + $0x170] sm:$0xff] }
 0x405   :  { %1921 = vrsqrt.f32 %v289_v50  ;;  %v1743_v50 = vpack.c.bf16 %v468_v46, %v466_v45  ;;  %v502_v45 = vld [vmem:[%s3149_s2 + $0x188] sm:$0xff]  ;;  %v504_v46 = vld [vmem:[%s3149_s2 + $0x198] sm:$0xff] }
 0x40f   :  { %v1922_v57 = vpop.eup %1921 }
 0x410   :  { %v292_v59 = vcombine.low %v1922_v57, %v1922_v57  ;;  %v472_v57 = vld [vmem:[%s3149_s2 + $0x98] sm:$0xff] }
 0x412   :  { %v299_v60 = vrot.slane %v292_v59, %v2416_v56  ;;  %v1510_v59 = vld [vmem:[%s3150_s4 + $0x48] sm:$0xff] }
 0x414   :  { %v306_v1 = vrot.slane %v299_v60, %v2416_v56  ;;  %v350_v60 = vld [vmem:[%s3150_s4 + $0x18] sm:$0xff] }
 0x416   :  { %v308_v2 = vmul.f32 %v306_v1, %v66_v61  ;;  %v1745_v61 = vpack.c.bf16 %v467_v52, %v465_v51  ;;  %v1747_v1 = vpack.c.bf16 %v472_v57, %v470_v53  ;;  %v506_v51 = vld [vmem:[%s3149_s2 + $0x1a8] sm:$0xff]  ;;  %v508_v52 = vld [vmem:[%s3149_s2 + $0x1b8] sm:$0xff] }
 0x417   :  { %v1783_v57 = vpack.c.bf16 %v508_v52, %v506_v51 }
 0x418   :  { %v313_v63 = vrot.slane %v308_v2, %v2094_v55  ;;  %v317_v54 = vrot.slane %v308_v2, %v2100_v58  ;;  %v471_v2 = vld [vmem:[%s3149_s2 + $0x90] sm:$0xff] }
 0x41a   :  { %v321_v11 = vmul.f32 %v317_v54, %v2157_v4  ;;  %v320_v62 = vmul.f32 %v313_v63, %v2167_v10  ;;  %v323_v0 = vmul.f32 %v317_v54, %v2161_v5  ;;  %v322_v12 = vmul.f32 %v313_v63, %v2171_v15 }
 0x41b   :  { %v325_v17 = vmul.f32 %v317_v54, %v2163_v8  ;;  %v327_v18 = vmul.f32 %v317_v54, %v2177_v13  ;;  %v324_v19 = vmul.f32 %v313_v63, %v2175_v16  ;;  %v326_v20 = vmul.f32 %v313_v63, %v2183_v14  ;;  %v454_v8 = vld [vmem:[%s3149_s2 + $0x8] sm:$0xff]  ;;  %v456_v16 = vld [vmem:[%s3149_s2 + $0x18] sm:$0xff] }
 0x41c   :  { %v340_v21 = vadd.f32 %v336_v7, %v321_v11  ;;  %v339_v22 = vadd.f32 %v332_v6, %v320_v62  ;;  %v342_v23 = vadd.f32 %v336_v7, %v323_v0  ;;  %v341_v24 = vadd.f32 %v332_v6, %v322_v12  ;;  %v474_v63 = vld [vmem:[%s3149_s2 + $0xa8] sm:$0xff]  ;;  %v476_v54 = vld [vmem:[%s3149_s2 + $0xb8] sm:$0xff]  ;;  %v473_v62 = vld [vmem:[%s3149_s2 + $0xa0] sm:$0xff] }
 0x41d   :  { %v344_v25 = vadd.f32 %v336_v7, %v325_v17  ;;  %v346_v4 = vadd.f32 %v336_v7, %v327_v18  ;;  %v343_v5 = vadd.f32 %v332_v6, %v324_v19  ;;  %v345_v15 = vadd.f32 %v332_v6, %v326_v20  ;;  %v1511_v6 = vld [vmem:[%s3150_s4 + $0x50] sm:$0xff]  ;;  %v478_v12 = vld [vmem:[%s3149_s2 + $0xc8] sm:$0xff]  ;;  %v480_v17 = vld [vmem:[%s3149_s2 + $0xd8] sm:$0xff] }
 0x41e   :  { %646 = vmatprep.mubr.f32.mxu0 %v340_v21  ;;  %v1659_v10 = vpack.c.bf16 %v342_v23, %v340_v21  ;;  %v1661_v26 = vpack.c.bf16 %v341_v24, %v339_v22  ;;  %v1731_v14 = vpack.c.bf16 %v456_v16, %v454_v8  ;;  %v1749_v7 = vpack.c.bf16 %v471_v2, %v469_v9  ;;  %v475_v0 = vld [vmem:[%s3149_s2 + $0xb0] sm:$0xff]  ;;  %v1512_v18 = vld [vmem:[%s3150_s4 + $0x58] sm:$0xff]  ;;  %v477_v21 = vld [vmem:[%s3149_s2 + $0xc0] sm:$0xff] }
 0x41f   :  { %647 = vmatmul.mubr.f32.vlgmr.msra.gmra.mrb[8].mxu0 %v339_v22  ;;  %v1663_v13 = vpack.c.bf16 %v346_v4, %v344_v25  ;;  %v1665_v29 = vpack.c.bf16 %v345_v15, %v343_v5  ;;  %v1751_v11 = vpack.c.bf16 %v476_v54, %v474_v63  ;;  %v1753_v19 = vpack.c.bf16 %v475_v0, %v473_v62  ;;  %v479_v22 = vld [vmem:[%s3149_s2 + $0xd0] sm:$0xff]  ;;  %v485_v16 = vld [vmem:[%s3149_s2 + $0x100] sm:$0xff]  ;;  %v512_v9 = vld [vmem:[%s3149_s2 + $0x1d8] sm:$0xff] }
 0x420   :  { %1660 = vmatprep.subr.bf16.mxu1 %v1659_v10  ;;  %652 = vmatprep.mubr.f32.mxu0 %v342_v23  ;;  %v1755_v20 = vpack.c.bf16 %v480_v17, %v478_v12  ;;  %v484_v23 = vld [vmem:[%s3149_s2 + $0xf8] sm:$0xff]  ;;  %v509_v63 = vld [vmem:[%s3149_s2 + $0x1c0] sm:$0xff]  ;;  %v511_v54 = vld [vmem:[%s3149_s2 + $0x1d0] sm:$0xff] }
 0x421   :  { %1796 = vmatprep.subr.bf16.mxu0 %v1659_v10  ;;  %1662 = vmatpush1.bf16.msra.mxu1 %v1661_v26  ;;  %v483_v10 = vld [vmem:[%s3149_s2 + $0xf0] sm:$0xff]  ;;  %v513_v0 = vld [vmem:[%s3149_s2 + $0x1e0] sm:$0xff] }
 0x422   :  { %1798 = vmatpush1.bf16.msra.mxu0 %v1661_v26  ;;  %1664 = vmatprep.subr.bf16.mxu1 %v1663_v13  ;;  %v486_v26 = vld [vmem:[%s3149_s2 + $0x108] sm:$0xff]  ;;  %v515_v12 = vld [vmem:[%s3149_s2 + $0x1f0] sm:$0xff] }
 0x423   :  { %1800 = vmatprep.subr.bf16.mxu0 %v1663_v13  ;;  %653 = vmatmul.mubr.f32.gmra.mrb[10].mxu0 %v341_v24  ;;  %v1757_v24 = vpack.c.bf16 %v479_v22, %v477_v21  ;;  %v487_v13 = vld [vmem:[%s3149_s2 + $0x110] sm:$0xff]  ;;  %v1793_v17 = vpack.c.bf16 %v515_v12, %v513_v0  ;;  %v1542_v0 = vld [vmem:[%s3149_s2 + $0x4c8] sm:$0xff]  ;;  %v1544_v12 = vld [vmem:[%s3149_s2 + $0x4d8] sm:$0xff] }
 0x424   :  { %658 = vmatprep.mubr.f32.mxu0 %v344_v25  ;;  %v1765_v28 = vpack.c.bf16 %v487_v13, %v485_v16 }
 0x425   :  { %1666 = vmatpush1.bf16.msra.mxu1 %v1665_v29 }
 0x426   :  { %1802 = vmatpush1.bf16.msra.mxu0 %v1665_v29  ;;  %1732 = vmatprep.subr.bf16.mxu1 %v1731_v14  ;;  %v490_v14 = vld [vmem:[%s3149_s2 + $0x128] sm:$0xff] }
 0x427   :  { %659 = vmatmul.mubr.f32.gmra.mrb[12].mxu0 %v343_v5  ;;  %v488_v5 = vld [vmem:[%s3149_s2 + $0x118] sm:$0xff]  ;;  %v1767_v29 = vpack.c.bf16 %v492_v27, %v490_v14  ;;  %v1521_v14 = vld [vmem:[%s3149_s2 + $0x420] sm:$0xff]  ;;  %v1523_v27 = vld [vmem:[%s3149_s2 + $0x430] sm:$0xff] }
 0x428   :  { %1441 = vmatmul.mubr.msk.f32.vlgmr.msra.gmra.mrb[0].mxu1 %vm351_vm3, %v347_v32  ;;  %664 = vmatprep.mubr.f32.mxu0 %v346_v4  ;;  %v481_v4 = vld [vmem:[%s3149_s2 + $0xe0] sm:$0xff]  ;;  %v1763_v8 = vpack.c.bf16 %v488_v5, %v486_v26  ;;  %v494_v32 = vld [vmem:[%s3149_s2 + $0x148] sm:$0xff] }
 0x429   :  { %434 = vmatprep.mubr.f32.mxu1 %v1927_v3  ;;  %1734 = vmatpush1.bf16.msra.mxu1 %v1733_v33  ;;  %v496_v33 = vld [vmem:[%s3149_s2 + $0x158] sm:$0xff] }
 0x42a   :  { %1736 = vmatprep.subr.bf16.mxu1 %v1735_v34  ;;  %v1769_v34 = vpack.c.bf16 %v491_v31, %v489_v30  ;;  %v1771_v35 = vpack.c.bf16 %v496_v33, %v494_v32  ;;  %v1809_v32 = vpack.c.bf16 %v1523_v27, %v1521_v14  ;;  %v1550_v14 = vld [vmem:[%s3149_s2 + $0x508] sm:$0xff]  ;;  %v1552_v27 = vld [vmem:[%s3149_s2 + $0x518] sm:$0xff] }
 0x42b   :  { %665 = vmatmul.mubr.f32.gmra.mrb[14].mxu0 %v345_v15  ;;  %v1761_v15 = vpack.c.bf16 %v483_v10, %v481_v4  ;;  %v1522_v4 = vld [vmem:[%s3149_s2 + $0x428] sm:$0xff]  ;;  %v1524_v10 = vld [vmem:[%s3149_s2 + $0x438] sm:$0xff] }
 0x42c   :  { %1442 = vmatmul.mubr.msk.f32.gmra.mrb[2].mxu1 %vm351_vm3, %v348_v40  ;;  %841 = vmatprep.mubr.f32.mxu0 %v1927_v3  ;;  %v500_v40 = vld [vmem:[%s3149_s2 + $0x178] sm:$0xff]  ;;  %v1807_v13 = vpack.c.bf16 %v1524_v10, %v1522_v4  ;;  %v1546_v4 = vld [vmem:[%s3149_s2 + $0x4e8] sm:$0xff] }
 0x42d   :  { %440 = vmatprep.mubr.f32.mxu1 %v1927_v3  ;;  %1738 = vmatpush1.bf16.msra.mxu1 %v1737_v41  ;;  %v1773_v41 = vpack.c.bf16 %v495_v37, %v493_v36  ;;  %v1527_v36 = vld [vmem:[%s3149_s2 + $0x450] sm:$0xff]  ;;  %v1548_v10 = vld [vmem:[%s3149_s2 + $0x4f8] sm:$0xff] }
 0x42e   :  { %1740 = vmatprep.subr.bf16.mxu1 %v1739_v42  ;;  %v1775_v42 = vpack.c.bf16 %v500_v40, %v498_v38  ;;  %v1530_v38 = vld [vmem:[%s3149_s2 + $0x468] sm:$0xff]  ;;  %v1532_v40 = vld [vmem:[%s3149_s2 + $0x478] sm:$0xff] }
 0x42f   :  { %1513 = vmatmul.mubr.msk.f32.vlgmr.msra.gmra.mrb[16].mxu0 %vm351_vm3, %v1509_v47  ;;  %v1777_v47 = vpack.c.bf16 %v499_v44, %v497_v43 }
 0x430   :  { %1443 = vmatmul.mubr.msk.f32.gmra.mrb[4].mxu1 %vm351_vm3, %v349_v48  ;;  %847 = vmatprep.mubr.f32.mxu0 %v1927_v3  ;;  %v1779_v48 = vpack.c.bf16 %v504_v46, %v502_v45  ;;  %v1815_v45 = vpack.c.bf16 %v1532_v40, %v1530_v38  ;;  %v1529_v46 = vld [vmem:[%s3149_s2 + $0x460] sm:$0xff]  ;;  %v1555_v40 = vld [vmem:[%s3149_s2 + $0x530] sm:$0xff] }
 0x431   :  { %446 = vmatprep.mubr.f32.mxu1 %v1927_v3  ;;  %1742 = vmatpush1.bf16.msra.mxu1 %v1741_v49  ;;  %v501_v49 = vld [vmem:[%s3149_s2 + $0x180] sm:$0xff] }
 0x432   :  { %1744 = vmatprep.subr.bf16.mxu1 %v1743_v50  ;;  %v503_v50 = vld [vmem:[%s3149_s2 + $0x190] sm:$0xff]  ;;  %v1553_v38 = vld [vmem:[%s3149_s2 + $0x520] sm:$0xff] }
 0x433   :  { %1514 = vmatmul.mubr.msk.f32.gmra.mrb[18].mxu0 %vm351_vm3, %v1510_v59  ;;  %v1781_v53 = vpack.c.bf16 %v503_v50, %v501_v49  ;;  %v505_v59 = vld [vmem:[%s3149_s2 + $0x1a0] sm:$0xff]  ;;  %v1534_v49 = vld [vmem:[%s3149_s2 + $0x488] sm:$0xff]  ;;  %v1536_v50 = vld [vmem:[%s3149_s2 + $0x498] sm:$0xff] }
 0x434   :  { %1444 = vmatmul.mubr.msk.f32.gmra.mrb[6].mxu1 %vm351_vm3, %v350_v60  ;;  %853 = vmatprep.mubr.f32.mxu0 %v1927_v3  ;;  %v507_v60 = vld [vmem:[%s3149_s2 + $0x1b0] sm:$0xff] }
 0x435   :  { %1746 = vmatpush1.bf16.msra.mxu1 %v1745_v61  ;;  %v1785_v61 = vpack.c.bf16 %v507_v60, %v505_v59  ;;  %v1819_v59 = vpack.c.bf16 %v1536_v50, %v1534_v49  ;;  %v1533_v60 = vld [vmem:[%s3149_s2 + $0x480] sm:$0xff]  ;;  %v1564_v49 = vld [vmem:[%s3149_s2 + $0x578] sm:$0xff] }
 0x436   :  { %1748 = vmatprep.subr.bf16.mxu1 %v1747_v1  ;;  %v510_v1 = vld [vmem:[%s3149_s2 + $0x1c8] sm:$0xff] }
 0x437   :  { %1515 = vmatmul.mubr.msk.f32.gmra.mrb[20].mxu0 %vm351_vm3, %v1511_v6  ;;  %v1787_v2 = vpack.c.bf16 %v512_v9, %v510_v1  ;;  %v1789_v6 = vpack.c.bf16 %v511_v54, %v509_v63  ;;  %v1538_v9 = vld [vmem:[%s3149_s2 + $0x4a8] sm:$0xff] }
 0x438   :  { %859 = vmatprep.mubr.f32.mxu0 %v1927_v3  ;;  %v482_v3 = vld [vmem:[%s3149_s2 + $0xe8] sm:$0xff] }
 0x439   :  { %1750 = vmatpush1.bf16.msra.mxu1 %v1749_v7  ;;  %v1759_v25 = vpack.c.bf16 %v484_v23, %v482_v3  ;;  %v514_v7 = vld [vmem:[%s3149_s2 + $0x1e8] sm:$0xff] }
 0x43a   :  { %1752 = vmatprep.subr.bf16.mxu1 %v1751_v11  ;;  %v516_v11 = vld [vmem:[%s3149_s2 + $0x1f8] sm:$0xff] }
 0x43b   :  { %1516 = vmatmul.mubr.msk.f32.gmra.mrb[22].mxu0 %vm351_vm3, %v1512_v18  ;;  %v1791_v62 = vpack.c.bf16 %v516_v11, %v514_v7  ;;  %v1518_v18 = vld [vmem:[%s3149_s2 + $0x408] sm:$0xff]  ;;  %v1537_v11 = vld [vmem:[%s3149_s2 + $0x4a0] sm:$0xff] }
 0x43d   :  { %1754 = vmatpush1.bf16.msra.mxu1 %v1753_v19  ;;  %v1520_v19 = vld [vmem:[%s3149_s2 + $0x418] sm:$0xff] }
 0x43e   :  { %1756 = vmatprep.subr.bf16.mxu1 %v1755_v20  ;;  %v1803_v20 = vpack.c.bf16 %v1520_v19, %v1518_v18 }
 0x441   :  { %1758 = vmatpush1.bf16.msra.mxu1 %v1757_v24  ;;  %v1517_v24 = vld [vmem:[%s3149_s2 + $0x400] sm:$0xff] }
 0x442   :  { %1760 = vmatprep.subr.bf16.mxu1 %v1759_v25  ;;  %v1519_v25 = vld [vmem:[%s3149_s2 + $0x410] sm:$0xff] }
 0x445   :  { %1762 = vmatpush1.bf16.msra.mxu1 %v1761_v15 }
 0x446   :  { %1764 = vmatprep.subr.bf16.mxu1 %v1763_v8  ;;  %v1805_v8 = vpack.c.bf16 %v1519_v25, %v1517_v24  ;;  %v1541_v24 = vld [vmem:[%s3149_s2 + $0x4c0] sm:$0xff]  ;;  %v1543_v25 = vld [vmem:[%s3149_s2 + $0x4d0] sm:$0xff] }
 0x449   :  { %1766 = vmatpush1.bf16.msra.mxu1 %v1765_v28  ;;  %v1526_v28 = vld [vmem:[%s3149_s2 + $0x448] sm:$0xff] }
 0x44a   :  { %1768 = vmatprep.subr.bf16.mxu1 %v1767_v29  ;;  %v1528_v29 = vld [vmem:[%s3149_s2 + $0x458] sm:$0xff] }
 0x44d   :  { %1770 = vmatpush1.bf16.msra.mxu1 %v1769_v34  ;;  %v1811_v34 = vpack.c.bf16 %v1528_v29, %v1526_v28  ;;  %v1835_v29 = vpack.c.bf16 %v1552_v27, %v1550_v14  ;;  %v1577_v27 = vld [vmem:[%s3149_s2 + $0x5e0] sm:$0xff] }
 0x44e   :  { %1772 = vmatprep.subr.bf16.mxu1 %v1771_v35  ;;  %v1525_v35 = vld [vmem:[%s3149_s2 + $0x440] sm:$0xff] }
 0x451   :  { %1774 = vmatpush1.bf16.msra.mxu1 %v1773_v41 }
 0x452   :  { %1776 = vmatprep.subr.bf16.mxu1 %v1775_v42  ;;  %v1813_v42 = vpack.c.bf16 %v1527_v36, %v1525_v35  ;;  %v1556_v35 = vld [vmem:[%s3149_s2 + $0x538] sm:$0xff] }
 0x455   :  { %1778 = vmatpush1.bf16.msra.mxu1 %v1777_v47  ;;  %v1531_v47 = vld [vmem:[%s3149_s2 + $0x470] sm:$0xff] }
 0x456   :  { %1780 = vmatprep.subr.bf16.mxu1 %v1779_v48  ;;  %v1817_v52 = vpack.c.bf16 %v1531_v47, %v1529_v46  ;;  %v1557_v46 = vld [vmem:[%s3149_s2 + $0x540] sm:$0xff]  ;;  %v1559_v47 = vld [vmem:[%s3149_s2 + $0x550] sm:$0xff] }
 0x457   :  { %v1845_v50 = vpack.c.bf16 %v1559_v47, %v1557_v46 }
 0x459   :  { %1782 = vmatpush1.bf16.msra.mxu1 %v1781_v53 }
 0x45a   :  { %1784 = vmatprep.subr.bf16.mxu1 %v1783_v57 }
 0x45d   :  { %1786 = vmatpush1.bf16.msra.mxu1 %v1785_v61  ;;  %v1535_v61 = vld [vmem:[%s3149_s2 + $0x490] sm:$0xff] }
 0x45e   :  { %1788 = vmatprep.subr.bf16.mxu1 %v1787_v2  ;;  %v1540_v2 = vld [vmem:[%s3149_s2 + $0x4b8] sm:$0xff]  ;;  %v1821_v54 = vpack.c.bf16 %v1535_v61, %v1533_v60  ;;  %v1566_v60 = vld [vmem:[%s3149_s2 + $0x588] sm:$0xff] }
 0x45f   :  { %v1823_v7 = vpack.c.bf16 %v1540_v2, %v1538_v9  ;;  %v1568_v61 = vld [vmem:[%s3149_s2 + $0x598] sm:$0xff]  ;;  %v1565_v2 = vld [vmem:[%s3149_s2 + $0x580] sm:$0xff] }
 0x460   :  { %v1851_v9 = vpack.c.bf16 %v1568_v61, %v1566_v60 }
 0x461   :  { %1790 = vmatpush1.bf16.msra.mxu1 %v1789_v6 }
 0x462   :  { %1792 = vmatprep.subr.bf16.mxu1 %v1791_v62  ;;  %v1539_v62 = vld [vmem:[%s3149_s2 + $0x4b0] sm:$0xff] }
 0x463   :  { %v1825_v18 = vpack.c.bf16 %v1539_v62, %v1537_v11  ;;  %v1572_v11 = vld [vmem:[%s3149_s2 + $0x5b8] sm:$0xff] }
 0x465   :  { %1794 = vmatpush1.bf16.msra.mxu1 %v1793_v17 }
 0x466   :  { %1804 = vmatprep.subr.bf16.mxu1 %v1803_v20  ;;  %v1827_v20 = vpack.c.bf16 %v1544_v12, %v1542_v0  ;;  %v1569_v12 = vld [vmem:[%s3149_s2 + $0x5a0] sm:$0xff] }
 0x4f2   :  { %v2675_v21 = vpop.f32.mrb[8].mxu0 }
 0x4f3   :  { %v2677_v22 = vpop.f32.mrb[9].mxu0 }
 0x4f6   :  { %v2679_v3 = vpop.f32.mrb[10].mxu0 }
 0x4f7   :  { %v2681_v23 = vpop.f32.mrb[11].mxu0 }
 0x4fa   :  { %v2695_v26 = vpop.f32.mrb[12].mxu0 }
 0x4fb   :  { %v430_v5 = vpop.f32.mrb[0].mxu1  ;;  %v2697_v15 = vpop.f32.mrb[13].mxu0 }
 0x4fc   :  { %v432_v16 = vpop.f32.mrb[1].mxu1 }
 0x4fd   :  { %735 = vmatprep.mubr.f32.mxu1 %v432_v16  ;;  %v1545_v16 = vld [vmem:[%s3149_s2 + $0x4e0] sm:$0xff] }
 0x4fe   :  { %v2711_v30 = vpop.f32.mrb[14].mxu0  ;;  %736 = vmatmul.mubr.f32.vlgmr.msra.gmra.mrb[8].mxu1 %v430_v5  ;;  %v1829_v5 = vpack.c.bf16 %v1543_v25, %v1541_v24  ;;  %v1576_v24 = vld [vmem:[%s3149_s2 + $0x5d8] sm:$0xff] }
 0x4ff   :  { %1806 = vmatpush1.bf16.msra.mxu1 %v1805_v8  ;;  %v2713_v31 = vpop.f32.mrb[15].mxu0  ;;  %v436_v33 = vpop.f32.mrb[2].mxu1  ;;  %v1831_v8 = vpack.c.bf16 %v1548_v10, %v1546_v4  ;;  %v1573_v10 = vld [vmem:[%s3149_s2 + $0x5c0] sm:$0xff] }
 0x500   :  { %1808 = vmatprep.subr.bf16.mxu1 %v1807_v13  ;;  %v438_v37 = vpop.f32.mrb[3].mxu1  ;;  %v1547_v13 = vld [vmem:[%s3149_s2 + $0x4f0] sm:$0xff] }
 0x501   :  { %741 = vmatprep.mubr.f32.mxu1 %v438_v37  ;;  %v1833_v28 = vpack.c.bf16 %v1547_v13, %v1545_v16  ;;  %v1580_v16 = vld [vmem:[%s3149_s2 + $0x5f8] sm:$0xff] }
 0x502   :  { %742 = vmatmul.mubr.f32.gmra.mrb[10].mxu1 %v436_v33  ;;  %v2727_v41 = vpop.f32.mrb[16].mxu0  ;;  %v1551_v33 = vld [vmem:[%s3149_s2 + $0x510] sm:$0xff] }
 0x503   :  { %1810 = vmatpush1.bf16.msra.mxu1 %v1809_v32  ;;  %v442_v43 = vpop.f32.mrb[4].mxu1  ;;  %v845_v44 = vpop.f32.mrb[17].mxu0  ;;  %v1549_v32 = vld [vmem:[%s3149_s2 + $0x500] sm:$0xff] }
 0x504   :  { %1812 = vmatprep.subr.bf16.mxu1 %v1811_v34  ;;  %v444_v48 = vpop.f32.mrb[5].mxu1  ;;  %v1554_v34 = vld [vmem:[%s3149_s2 + $0x528] sm:$0xff]  ;;  %v1837_v36 = vpack.c.bf16 %v1551_v33, %v1549_v32 }
 0x505   :  { %747 = vmatprep.mubr.f32.mxu1 %v444_v48  ;;  %v1839_v37 = vpack.c.bf16 %v1556_v35, %v1554_v34  ;;  %v1562_v48 = vld [vmem:[%s3149_s2 + $0x568] sm:$0xff] }
 0x506   :  { %748 = vmatmul.mubr.f32.gmra.mrb[12].mxu1 %v442_v43  ;;  %v2741_v51 = vpop.f32.mrb[18].mxu0  ;;  %v1560_v43 = vld [vmem:[%s3149_s2 + $0x558] sm:$0xff] }
 0x507   :  { %1814 = vmatpush1.bf16.msra.mxu1 %v1813_v42  ;;  %v448_v53 = vpop.f32.mrb[6].mxu1  ;;  %v2743_v57 = vpop.f32.mrb[19].mxu0  ;;  %v1558_v42 = vld [vmem:[%s3149_s2 + $0x548] sm:$0xff] }
 0x508   :  { %1816 = vmatprep.subr.bf16.mxu1 %v1815_v45  ;;  %v450_v1 = vpop.f32.mrb[7].mxu1  ;;  %v1843_v45 = vpack.c.bf16 %v1560_v43, %v1558_v42 }
 0x509   :  { %753 = vmatprep.mubr.f32.mxu1 %v450_v1 }
 0x50a   :  { %754 = vmatmul.mubr.f32.gmra.mrb[14].mxu1 %v448_v53  ;;  %v2757_v63 = vpop.f32.mrb[20].mxu0  ;;  %v1561_v53 = vld [vmem:[%s3149_s2 + $0x560] sm:$0xff] }
 0x50b   :  { %1818 = vmatpush1.bf16.msra.mxu1 %v1817_v52  ;;  %995 = vmatprep.mubr.f32.mxu1 %v845_v44  ;;  %v2759_v6 = vpop.f32.mrb[21].mxu0  ;;  %v1841_v44 = vpack.c.bf16 %v1555_v40, %v1553_v38  ;;  %v1847_v52 = vpack.c.bf16 %v1564_v49, %v1562_v48 }
 0x50c   :  { %1820 = vmatprep.subr.bf16.mxu1 %v1819_v59  ;;  %v1563_v59 = vld [vmem:[%s3149_s2 + $0x570] sm:$0xff] }
 0x50d   :  { %v1849_v1 = vpack.c.bf16 %v1563_v59, %v1561_v53 }
 0x50e   :  { %v2773_v17 = vpop.f32.mrb[22].mxu0 }
 0x50f   :  { %1822 = vmatpush1.bf16.msra.mxu1 %v1821_v54  ;;  %v2775_v19 = vpop.f32.mrb[23].mxu0  ;;  %v1567_v54 = vld [vmem:[%s3149_s2 + $0x590] sm:$0xff] }
 0x510   :  { %1824 = vmatprep.subr.bf16.mxu1 %v1823_v7  ;;  %v1570_v7 = vld [vmem:[%s3149_s2 + $0x5a8] sm:$0xff]  ;;  %v1853_v62 = vpack.c.bf16 %v1567_v54, %v1565_v2 }
 0x511   :  { %v1855_v0 = vpack.c.bf16 %v1572_v11, %v1570_v7 }
 0x513   :  { %1826 = vmatpush1.bf16.msra.mxu1 %v1825_v18  ;;  %v1571_v18 = vld [vmem:[%s3149_s2 + $0x5b0] sm:$0xff] }
 0x514   :  { %1828 = vmatprep.subr.bf16.mxu1 %v1827_v20  ;;  %v1574_v20 = vld [vmem:[%s3149_s2 + $0x5c8] sm:$0xff]  ;;  %v1857_v25 = vpack.c.bf16 %v1571_v18, %v1569_v12 }
 0x515   :  { %v1859_v4 = vpack.c.bf16 %v1576_v24, %v1574_v20 }
 0x517   :  { %1830 = vmatpush1.bf16.msra.mxu1 %v1829_v5  ;;  %v1575_v5 = vld [vmem:[%s3149_s2 + $0x5d0] sm:$0xff] }
 0x518   :  { %1832 = vmatprep.subr.bf16.mxu1 %v1831_v8  ;;  %v1578_v8 = vld [vmem:[%s3149_s2 + $0x5e8] sm:$0xff]  ;;  %v1861_v13 = vpack.c.bf16 %v1575_v5, %v1573_v10 }
 0x519   :  { %v1863_v14 = vpack.c.bf16 %v1580_v16, %v1578_v8 }
 0x51b   :  { %1834 = vmatpush1.bf16.msra.mxu1 %v1833_v28  ;;  %v1579_v28 = vld [vmem:[%s3149_s2 + $0x5f0] sm:$0xff] }
 0x51c   :  { %1836 = vmatprep.subr.bf16.mxu1 %v1835_v29  ;;  %v1865_v29 = vpack.c.bf16 %v1579_v28, %v1577_v27 }
 0x51f   :  { %1838 = vmatpush1.bf16.msra.mxu1 %v1837_v36 }
 0x520   :  { %1840 = vmatprep.subr.bf16.mxu1 %v1839_v37 }
 0x523   :  { %1842 = vmatpush1.bf16.msra.mxu1 %v1841_v44 }
 0x524   :  { %1844 = vmatprep.subr.bf16.mxu1 %v1843_v45 }
 0x527   :  { %1846 = vmatpush1.bf16.msra.mxu1 %v1845_v50 }
 0x528   :  { %1848 = vmatprep.subr.bf16.mxu1 %v1847_v52 }
 0x52b   :  { %1850 = vmatpush1.bf16.msra.mxu1 %v1849_v1 }
 0x52c   :  { %1852 = vmatprep.subr.bf16.mxu1 %v1851_v9 }
 0x52f   :  { %1854 = vmatpush1.bf16.msra.mxu1 %v1853_v62 }
 0x530   :  { %1856 = vmatprep.subr.bf16.mxu1 %v1855_v0 }
 0x533   :  { %1858 = vmatpush1.bf16.msra.mxu1 %v1857_v25 }
 0x534   :  { %1860 = vmatprep.subr.bf16.mxu1 %v1859_v4 }
 0x537   :  { %1862 = vmatpush1.bf16.msra.mxu1 %v1861_v13 }
 0x538   :  { %1864 = vmatprep.subr.bf16.mxu1 %v1863_v14 }
 0x53b   :  { %1866 = vmatpush1.bf16.msra.mxu1 %v1865_v29 }
 0x53e   :  { %996 = vmatmul.mubr.f32.vlgmr.msra.gmra.mrb[8].mxu1 %v2727_v41  ;;  %v1028_v41 = vld [vmem:[%s3151_s6] sm:$0x3] }
 0x53f   :  { %1001 = vmatprep.mubr.f32.mxu1 %v2743_v57 }
 0x542   :  { %1002 = vmatmul.mubr.f32.gmra.mrb[10].mxu1 %v2741_v51  ;;  %v1035_v51 = vrot.slane %v1028_v41, %v2094_v55 }
 0x543   :  { %1007 = vmatprep.mubr.f32.mxu1 %v2759_v6 }
 0x546   :  { %1008 = vmatmul.mubr.f32.gmra.mrb[12].mxu1 %v2757_v63 }
 0x547   :  { %1013 = vmatprep.mubr.f32.mxu1 %v2775_v19  ;;  %v1039_v19 = vrot.slane %v1028_v41, %v2100_v58 }
 0x54a   :  { %1014 = vmatmul.mubr.f32.gmra.mrb[14].mxu1 %v2773_v17 }
 0x611   :  { %v997_v32 = vpop.f32.mrb[8].mxu1 }
 0x612   :  { %v1899_v33 = vadd.f32 %v997_v32, %v2675_v21  ;;  %v999_v34 = vpop.f32.mrb[9].mxu1 }
 0x613   :  { %v1900_v57 = vadd.f32 %v999_v34, %v2677_v22 }
 0x614   :  { %v2911_v38 = vadd.f32 %v1899_v33, %v1035_v51 }
 0x615   :  { %v1003_v35 = vpop.f32.mrb[10].mxu1  ;;  %v2914_v42 = vadd.f32 %v1900_v57, %v1039_v19 }
 0x616   :  { %v1901_v6 = vadd.f32 %v1003_v35, %v2679_v3  ;;  %v1005_v63 = vpop.f32.mrb[11].mxu1  ;;  %v1050_v47 = vmax.f32 %v2911_v38, 0.0 }
 0x617   :  { %v1902_v17 = vadd.f32 %v1005_v63, %v2681_v23  ;;  %v1051_v50 = vmax.f32 %v2914_v42, 0.0 }
 0x618   :  { %v2907_v36 = vadd.f32 %v1901_v6, %v1035_v51 }
 0x619   :  { %v2909_v21 = vadd.f32 %v1902_v17, %v1039_v19  ;;  %v1009_v37 = vpop.f32.mrb[12].mxu1 }
 0x61a   :  { %v1903_v40 = vadd.f32 %v1009_v37, %v2695_v26  ;;  %v1011_v22 = vpop.f32.mrb[13].mxu1  ;;  %v1052_v3 = vmax.f32 %v2907_v36, 0.0 }
 0x61b   :  { %v1904_v43 = vadd.f32 %v1011_v22, %v2697_v15  ;;  %v1053_v23 = vmax.f32 %v2909_v21, 0.0 }
 0x61c   :  { %v2918_v44 = vadd.f32 %v1903_v40, %v1035_v51  ;;  %v1058_v53 = vadd.f32 %v1052_v3, %v1050_v47 }
 0x61d   :  { %v1047_v45 = vadd.f32 %v1904_v43, %v1039_v19  ;;  %v1015_v46 = vpop.f32.mrb[14].mxu1  ;;  %v1067_v60 = vadd.f32 %v1053_v23, %v1051_v50 }
 0x61e   :  { %v1054_v48 = vmax.f32 %v2918_v44, 0.0  ;;  %v1905_v49 = vadd.f32 %v1015_v46, %v2711_v30  ;;  %v1017_v26 = vpop.f32.mrb[15].mxu1 }
 0x61f   :  { %v1055_v52 = vmax.f32 %v1047_v45, 0.0  ;;  %v1906_v15 = vadd.f32 %v1017_v26, %v2713_v31 }
 0x620   :  { %v1048_v59 = vadd.f32 %v1905_v49, %v1035_v51  ;;  %v1059_v1 = vadd.f32 %v1058_v53, %v1054_v48 }
 0x621   :  { %v1049_v61 = vadd.f32 %v1906_v15, %v1039_v19  ;;  %v1068_v2 = vadd.f32 %v1067_v60, %v1055_v52 }
 0x622   :  { %v1056_v9 = vmax.f32 %v1048_v59, 0.0 }
 0x623   :  { %v1057_v54 = vmax.f32 %v1049_v61, 0.0 }
 0x624   :  { %v1060_v7 = vadd.f32 %v1059_v1, %v1056_v9 }
 0x625   :  { %v1069_v11 = vadd.f32 %v1068_v2, %v1057_v54 }
 0x626   :  { %v1061_v62 = vrot.slane %v1060_v7, 4 }
 0x627   :  { %v1070_v30 = vrot.slane %v1069_v11, 4 }
 0x628   :  { %v1062_v0 = vadd.f32 %v1061_v62, %v1060_v7 }
 0x629   :  { %v1071_v12 = vadd.f32 %v1070_v30, %v1069_v11 }
 0x62a   :  { %v1063_v18 = vrot.slane %v1062_v0, 2 }
 0x62b   :  { %v1072_v20 = vrot.slane %v1071_v12, 2 }
 0x62c   :  { %v1064_v24 = vadd.f32 %v1063_v18, %v1062_v0 }
 0x62d   :  { %v1073_v31 = vadd.f32 %v1072_v20, %v1071_v12 }
 0x62e   :  { %v1065_v25 = vrot.slane %v1064_v24, 1 }
 0x62f   :  { %v1074_v4 = vrot.slane %v1073_v31, 1 }
 0x630   :  { %v1066_v10 = vadd.f32 %v1065_v25, %v1064_v24 }
 0x631   :  { %v1075_v5 = vadd.f32 %v1074_v4, %v1073_v31 }
 0x632   :  { %1076 = vrot.lane.b32.xlu0 %v1066_v10, %s1928_s0 }
 0x633   :  { %1078 = vrot.lane.b32.xlu1 %v1075_v5, %s1928_s0 }
 0x6a4   :  { %v1077_v8 = vpop.permute.xlu0 %1076 }
 0x6a5   :  { %v1079_v16 = vpop.permute.xlu1 %1078 }
 0x6a6   :  { %v1080_v13 = vsel %vm200_vm0, %v1077_v8, %v1079_v16  ;;  %v1081_v14 = vsel %vm200_vm0, %v1079_v16, %v1077_v8  ;;  %v1240_v16 = vld [vmem:[%s3152_s3 + $0x80] sm:$0xff] }
 0x6a7   :  { %v1082_v27 = vadd.f32 %v1081_v14, %v1066_v10  ;;  %v1083_v28 = vadd.f32 %v1080_v13, %v1075_v5  ;;  %v1241_v13 = vld [vmem:[%s3152_s3 + $0x88] sm:$0xff] }
 0x6a8   :  { %v1867_v14 = vpack.c.bf16 %v1241_v13, %v1240_v16  ;;  %v1239_v16 = vld [vmem:[%s3152_s3 + $0x78] sm:$0xff] }
 0x6a9   :  { %1084 = vrot.lane.b32.xlu0 %v1082_v27, %s1929_s12  ;;  %1086 = vrot.lane.b32.xlu1 %v1083_v28, %s1929_s12 }
 0x6aa   :  { %1868 = vmatprep.subr.bf16.mxu0 %v1867_v14 }
 0x71b   :  { %v1085_v29 = vpop.permute.xlu0 %1084  ;;  %v1087_v32 = vpop.permute.xlu1 %1086 }
 0x71c   :  { %v1088_v33 = vsel %vm209_vm1, %v1085_v29, %v1087_v32  ;;  %v1089_v34 = vsel %vm209_vm1, %v1087_v32, %v1085_v29  ;;  %v1242_v32 = vld [vmem:[%s3152_s3 + $0x90] sm:$0xff] }
 0x71d   :  { %v1090_v41 = vadd.f32 %v1089_v34, %v1082_v27  ;;  %v1091_v57 = vadd.f32 %v1088_v33, %v1083_v28  ;;  %v1224_v27 = vld [vmem:[%s3152_s3] sm:$0xff]  ;;  %v1225_v28 = vld [vmem:[%s3152_s3 + $0x8] sm:$0xff]  ;;  %v1243_v33 = vld [vmem:[%s3152_s3 + $0x98] sm:$0xff] }
 0x71e   :  { %v1869_v29 = vpack.c.bf16 %v1225_v28, %v1224_v27  ;;  %v1871_v34 = vpack.c.bf16 %v1243_v33, %v1242_v32 }
 0x71f   :  { %1092 = vrot.lane.b32.xlu0 %v1090_v41, %s1930_s13  ;;  %1094 = vrot.lane.b32.xlu1 %v1091_v57, %s1930_s13 }
 0x720   :  { %1870 = vmatpush3.bf16.msra.mxu0 %v1869_v29 }
 0x721   :  { %1872 = vmatprep.subr.bf16.mxu0 %v1871_v34 }
 0x791   :  { %v1093_v35 = vpop.permute.xlu0 %1092  ;;  %v1095_v51 = vpop.permute.xlu1 %1094 }
 0x792   :  { %v1096_v6 = vsel %vm218_vm2, %v1093_v35, %v1095_v51  ;;  %v1097_v63 = vsel %vm218_vm2, %v1095_v51, %v1093_v35  ;;  %v1244_v51 = vld [vmem:[%s3152_s3 + $0xa0] sm:$0xff] }
 0x793   :  { %v1098_v19 = vadd.f32 %v1097_v63, %v1090_v41  ;;  %v1099_v17 = vadd.f32 %v1096_v6, %v1091_v57  ;;  %v1226_v41 = vld [vmem:[%s3152_s3 + $0x10] sm:$0xff]  ;;  %v1227_v57 = vld [vmem:[%s3152_s3 + $0x18] sm:$0xff]  ;;  %v1245_v6 = vld [vmem:[%s3152_s3 + $0xa8] sm:$0xff] }
 0x794   :  { %v1873_v35 = vpack.c.bf16 %v1227_v57, %v1226_v41 }
 0x795   :  { %v1100_v21 = vadd.f32 %v1099_v17, %v1098_v19  ;;  %v1875_v17 = vpack.c.bf16 %v1245_v6, %v1244_v51 }
 0x796   :  { %1874 = vmatpush3.bf16.msra.mxu0 %v1873_v35 }
 0x797   :  { %v1101_v37 = vmul.f32 0.001953125, %v1100_v21  ;;  %v1228_v21 = vld [vmem:[%s3152_s3 + $0x20] sm:$0xff]  ;;  %1876 = vmatprep.subr.bf16.mxu0 %v1875_v17 }
 0x799   :  { %v1105_v38 = vrot.slane %v1101_v37, %v2094_v55  ;;  %v1229_v37 = vld [vmem:[%s3152_s3 + $0x28] sm:$0xff] }
 0x79b   :  { %v2947_v40 = vsub.f32 %v1051_v50, %v1105_v38  ;;  %v2949_v22 = vsub.f32 %v1053_v23, %v1105_v38  ;;  %v2951_v42 = vsub.f32 %v1055_v52, %v1105_v38  ;;  %v2953_v43 = vsub.f32 %v1050_v47, %v1105_v38 }
 0x79c   :  { %v2957_v44 = vsub.f32 %v1052_v3, %v1105_v38  ;;  %v2959_v45 = vsub.f32 %v1054_v48, %v1105_v38  ;;  %v2961_v46 = vsub.f32 %v1057_v54, %v1105_v38  ;;  %v2967_v23 = vsub.f32 %v1056_v9, %v1105_v38 }
 0x79d   :  { %v1115_v49 = vmul.f32 %v2947_v40, %v2947_v40  ;;  %v1117_v26 = vmul.f32 %v2949_v22, %v2949_v22  ;;  %v1114_v47 = vmul.f32 %v2953_v43, %v2953_v43  ;;  %v1119_v3 = vmul.f32 %v2951_v42, %v2951_v42 }
 0x79e   :  { %v1116_v36 = vmul.f32 %v2957_v44, %v2957_v44  ;;  %v1118_v50 = vmul.f32 %v2959_v45, %v2959_v45  ;;  %v1121_v15 = vmul.f32 %v2961_v46, %v2961_v46  ;;  %v1120_v59 = vmul.f32 %v2967_v23, %v2967_v23 }
 0x79f   :  { %v1131_v48 = vadd.f32 %v1117_v26, %v1115_v49  ;;  %v1877_v26 = vpack.c.bf16 %v1229_v37, %v1228_v21 }
 0x7a0   :  { %v1122_v52 = vadd.f32 %v1116_v36, %v1114_v47 }
 0x7a1   :  { %v1132_v53 = vadd.f32 %v1131_v48, %v1119_v3  ;;  %1878 = vmatpush3.bf16.msra.mxu0 %v1877_v26  ;;  %v1246_v3 = vld [vmem:[%s3152_s3 + $0xb0] sm:$0xff]  ;;  %v1247_v48 = vld [vmem:[%s3152_s3 + $0xb8] sm:$0xff] }
 0x7a2   :  { %v1123_v60 = vadd.f32 %v1122_v52, %v1118_v50  ;;  %v1879_v50 = vpack.c.bf16 %v1247_v48, %v1246_v3  ;;  %v1230_v52 = vld [vmem:[%s3152_s3 + $0x30] sm:$0xff] }
 0x7a3   :  { %v1133_v61 = vadd.f32 %v1132_v53, %v1121_v15  ;;  %v1231_v15 = vld [vmem:[%s3152_s3 + $0x38] sm:$0xff] }
 0x7a4   :  { %v1124_v1 = vadd.f32 %v1123_v60, %v1120_v59  ;;  %v1881_v53 = vpack.c.bf16 %v1231_v15, %v1230_v52  ;;  %1880 = vmatprep.subr.bf16.mxu0 %v1879_v50  ;;  %v1248_v59 = vld [vmem:[%s3152_s3 + $0xc0] sm:$0xff]  ;;  %v1249_v60 = vld [vmem:[%s3152_s3 + $0xc8] sm:$0xff] }
 0x7a5   :  { %v1134_v9 = vrot.slane %v1133_v61, 4 }
 0x7a6   :  { %v1125_v2 = vrot.slane %v1124_v1, 4  ;;  %1882 = vmatpush3.bf16.msra.mxu0 %v1881_v53 }
 0x7a7   :  { %v1135_v54 = vadd.f32 %v1134_v9, %v1133_v61  ;;  %v1883_v61 = vpack.c.bf16 %v1249_v60, %v1248_v59  ;;  %v1233_v9 = vld [vmem:[%s3152_s3 + $0x48] sm:$0xff] }
 0x7a8   :  { %v1126_v7 = vadd.f32 %v1125_v2, %v1124_v1  ;;  %v1232_v1 = vld [vmem:[%s3152_s3 + $0x40] sm:$0xff] }
 0x7a9   :  { %v1136_v11 = vrot.slane %v1135_v54, 2  ;;  %v1885_v2 = vpack.c.bf16 %v1233_v9, %v1232_v1  ;;  %1884 = vmatprep.subr.bf16.mxu0 %v1883_v61 }
 0x7aa   :  { %v1127_v62 = vrot.slane %v1126_v7, 2 }
 0x7ab   :  { %v1137_v30 = vadd.f32 %v1136_v11, %v1135_v54  ;;  %1886 = vmatpush3.bf16.msra.mxu0 %v1885_v2  ;;  %v1250_v54 = vld [vmem:[%s3152_s3 + $0xd0] sm:$0xff] }
 0x7ac   :  { %v1128_v0 = vadd.f32 %v1127_v62, %v1126_v7  ;;  %v1251_v7 = vld [vmem:[%s3152_s3 + $0xd8] sm:$0xff]  ;;  %v1234_v62 = vld [vmem:[%s3152_s3 + $0x50] sm:$0xff] }
 0x7ad   :  { %v1138_v12 = vrot.slane %v1137_v30, 1  ;;  %v1887_v11 = vpack.c.bf16 %v1251_v7, %v1250_v54 }
 0x7ae   :  { %v1129_v18 = vrot.slane %v1128_v0, 1 }
 0x7af   :  { %v1139_v20 = vadd.f32 %v1138_v12, %v1137_v30  ;;  %v1235_v30 = vld [vmem:[%s3152_s3 + $0x58] sm:$0xff]  ;;  %1888 = vmatprep.subr.bf16.mxu0 %v1887_v11  ;;  %v1252_v12 = vld [vmem:[%s3152_s3 + $0xe0] sm:$0xff] }
 0x7b0   :  { %v1130_v24 = vadd.f32 %v1129_v18, %v1128_v0  ;;  %v1889_v0 = vpack.c.bf16 %v1235_v30, %v1234_v62  ;;  %v1253_v18 = vld [vmem:[%s3152_s3 + $0xe8] sm:$0xff] }
 0x7b1   :  { %1142 = vrot.lane.b32.xlu1 %v1139_v20, %s1928_s0 }
 0x7b2   :  { %1140 = vrot.lane.b32.xlu0 %v1130_v24, %s1928_s0  ;;  %1890 = vmatpush3.bf16.msra.mxu0 %v1889_v0 }
 0x823   :  { %v1143_v31 = vpop.permute.xlu1 %1142 }
 0x824   :  { %v1141_v25 = vpop.permute.xlu0 %1140 }
 0x825   :  { %v1144_v4 = vsel %vm200_vm0, %v1141_v25, %v1143_v31  ;;  %v1145_v10 = vsel %vm200_vm0, %v1143_v31, %v1141_v25  ;;  %v1237_v31 = vld [vmem:[%s3152_s3 + $0x68] sm:$0xff] }
 0x826   :  { %v1146_v5 = vadd.f32 %v1145_v10, %v1130_v24  ;;  %v1147_v8 = vadd.f32 %v1144_v4, %v1139_v20  ;;  %v1891_v20 = vpack.c.bf16 %v1253_v18, %v1252_v12  ;;  %v1236_v24 = vld [vmem:[%s3152_s3 + $0x60] sm:$0xff]  ;;  %v1254_v4 = vld [vmem:[%s3152_s3 + $0xf0] sm:$0xff]  ;;  %v1255_v10 = vld [vmem:[%s3152_s3 + $0xf8] sm:$0xff] }
 0x827   :  { %v1893_v25 = vpack.c.bf16 %v1237_v31, %v1236_v24 }
 0x828   :  { %1148 = vrot.lane.b32.xlu0 %v1146_v5, %s1929_s12  ;;  %1150 = vrot.lane.b32.xlu1 %v1147_v8, %s1929_s12 }
 0x829   :  { %1892 = vmatprep.subr.bf16.mxu0 %v1891_v20 }
 0x82a   :  { %1894 = vmatpush3.bf16.msra.mxu0 %v1893_v25 }
 0x89a   :  { %v1149_v63 = vpop.permute.xlu0 %1148  ;;  %v1151_v19 = vpop.permute.xlu1 %1150 }
 0x89b   :  { %v1152_v38 = vsel %vm209_vm1, %v1149_v63, %v1151_v19  ;;  %v1153_v49 = vsel %vm209_vm1, %v1151_v19, %v1149_v63  ;;  %v1029_v63 = vld [vmem:[%s3151_s6 + $0x2] sm:$0x3] }
 0x89c   :  { %v1154_v47 = vadd.f32 %v1153_v49, %v1146_v5  ;;  %v1155_v36 = vadd.f32 %v1152_v38, %v1147_v8  ;;  %v1238_v5 = vld [vmem:[%s3152_s3 + $0x70] sm:$0xff]  ;;  %v1895_v8 = vpack.c.bf16 %v1255_v10, %v1254_v4  ;;  %v1209_v38 = vrot.slane %v1030_v39, %v2094_v55 }
 0x89d   :  { %v1897_v13 = vpack.c.bf16 %v1239_v16, %v1238_v5  ;;  %v1213_v49 = vrot.slane %v1030_v39, %v2100_v58 }
 0x89e   :  { %1156 = vrot.lane.b32.xlu0 %v1154_v47, %s1930_s13  ;;  %1158 = vrot.lane.b32.xlu1 %v1155_v36, %s1930_s13 }
 0x89f   :  { %1896 = vmatprep.subr.bf16.mxu0 %v1895_v8 }
 0x8a0   :  { %1898 = vmatpush3.bf16.msra.mxu0 %v1897_v13 }
 0x910   :  { %v1157_v14 = vpop.permute.xlu0 %1156  ;;  %v1159_v27 = vpop.permute.xlu1 %1158 }
 0x911   :  { %v1160_v28 = vsel %vm218_vm2, %v1157_v14, %v1159_v27  ;;  %v1161_v29 = vsel %vm218_vm2, %v1159_v27, %v1157_v14 }
 0x912   :  { %v1162_v32 = vadd.f32 %v1161_v29, %v1154_v47  ;;  %v1163_v33 = vadd.f32 %v1160_v28, %v1155_v36 }
 0x914   :  { %v1164_v34 = vadd.f32 %v1163_v33, %v1162_v32 }
 0x916   :  { %v1165_v41 = vmul.f32 0.001953125, %v1164_v34 }
 0x918   :  { %v1166_v57 = vadd.f32 1e-05, %v1165_v41 }
 0x91a   :  { %1923 = vrsqrt.f32 %v1166_v57 }
 0x924   :  { %v1924_v35 = vpop.eup %1923 }
 0x925   :  { %v1169_v51 = vcombine.low %v1924_v35, %v1924_v35 }
 0x927   :  { %v1176_v6 = vrot.slane %v1169_v51, %v2416_v56 }
 0x929   :  { %v1183_v19 = vrot.slane %v1176_v6, %v2416_v56 }
 0x92b   :  { %v1185_v17 = vmul.f32 %v1183_v19, %v1029_v63 }
 0x92d   :  { %v1190_v21 = vrot.slane %v1185_v17, %v2094_v55  ;;  %v1194_v37 = vrot.slane %v1185_v17, %v2100_v58 }
 0x92f   :  { %v1198_v26 = vmul.f32 %v1194_v37, %v2947_v40  ;;  %v1197_v47 = vmul.f32 %v1190_v21, %v2953_v43  ;;  %v1200_v36 = vmul.f32 %v1194_v37, %v2949_v22  ;;  %v1199_v48 = vmul.f32 %v1190_v21, %v2957_v44 }
 0x930   :  { %v1202_v52 = vmul.f32 %v1194_v37, %v2951_v42  ;;  %v1201_v53 = vmul.f32 %v1190_v21, %v2959_v45  ;;  %v1204_v40 = vmul.f32 %v1194_v37, %v2961_v46  ;;  %v1203_v22 = vmul.f32 %v1190_v21, %v2967_v23  ;;  %v1581_v45 = vld [vmem:[%s3153_s7] ss:$0 sm:$0xff] }
 0x931   :  { %v1217_v56 = vadd.f32 %v1213_v49, %v1198_v26  ;;  %v1216_v3 = vadd.f32 %v1209_v38, %v1197_v47  ;;  %v1219_v50 = vadd.f32 %v1213_v49, %v1200_v36  ;;  %v1218_v15 = vadd.f32 %v1209_v38, %v1199_v48 }
 0x932   :  { %v1221_v58 = vadd.f32 %v1213_v49, %v1202_v52  ;;  %v1220_v43 = vadd.f32 %v1209_v38, %v1201_v53  ;;  %v1223_v59 = vadd.f32 %v1213_v49, %v1204_v40  ;;  %v1222_v44 = vadd.f32 %v1209_v38, %v1203_v22 }
 0x933   :  { %1329 = vmatprep.mubr.f32.mxu0 %v1217_v56 }
 0x934   :  { %1330 = vmatmul.mubr.f32.vlgmr.msra.gmra.mrb[24].mxu0 %v1216_v3 }
 0x935   :  { %1334 = vmatprep.mubr.f32.mxu0 %v1219_v50 }
 0x938   :  { %1335 = vmatmul.mubr.f32.gmra.mrb[26].mxu0 %v1218_v15 }
 0x939   :  { %1339 = vmatprep.mubr.f32.mxu0 %v1221_v58 }
 0x93c   :  { %1340 = vmatmul.mubr.f32.gmra.mrb[28].mxu0 %v1220_v43 }
 0x93d   :  { %1344 = vmatprep.mubr.f32.mxu0 %v1223_v59 }
 0x940   :  { %1345 = vmatmul.mubr.f32.gmra.mrb[30].mxu0 %v1222_v44 }
 0xa07   :  { %v1615_v60 = vpop.f32.mrb[24].mxu0 }
 0xa08   :  { %v1616_v42 = vpop.f32.mrb[25].mxu0 }
 0xa09   :  { %v1617_v61 = vadd.f32 %v1616_v42, %v1615_v60 }
 0xa0b   :  { %v1618_v1 = vpop.f32.mrb[26].mxu0  ;;  %v1332_v11 = vadd.f32 %v1617_v61, %v1581_v45 }
 0xa0c   :  { %v1619_v9 = vpop.f32.mrb[27].mxu0 }
 0xa0d   :  { %v1620_v2 = vadd.f32 %v1619_v9, %v1618_v1  ;;  %v1350_v18 = vmax.f32 %v1332_v11, 0.0  ;;  %v1257_v9 = vld [vmem:[%s3153_s7 + $0x1] sm:$0x1] }
 0xa0f   :  { %v1337_v46 = vadd.f32 %v1620_v2, %v1581_v45  ;;  %v1621_v54 = vpop.f32.mrb[28].mxu0 }
 0xa10   :  { %v1622_v7 = vpop.f32.mrb[29].mxu0 }
 0xa11   :  { %v1623_v23 = vadd.f32 %v1622_v7, %v1621_v54  ;;  %v1351_v62 = vmax.f32 %v1337_v46, 0.0  ;;  %v1582_v54 = vld [vmem:[%s3153_s7 + $0x2] ss:$0 sm:$0xff] }
 0xa13   :  { %v1342_v30 = vadd.f32 %v1623_v23, %v1581_v45  ;;  %v1624_v0 = vpop.f32.mrb[30].mxu0  ;;  %v1354_v31 = vadd.f32 %v1351_v62, %v1350_v18 }
 0xa14   :  { %v1625_v12 = vpop.f32.mrb[31].mxu0 }
 0xa15   :  { %v1352_v20 = vmax.f32 %v1342_v30, 0.0  ;;  %v1626_v24 = vadd.f32 %v1625_v12, %v1624_v0 }
 0xa17   :  { %v1347_v25 = vadd.f32 %v1626_v24, %v1581_v45  ;;  %v1355_v4 = vadd.f32 %v1354_v31, %v1352_v20 }
 0xa19   :  { %v1353_v10 = vmax.f32 %v1347_v25, 0.0 }
 0xa1b   :  { %v1356_v5 = vadd.f32 %v1355_v4, %v1353_v10 }
 0xa1d   :  { %v1357_v8 = vrot.slane %v1356_v5, 4 }
 0xa1f   :  { %v1358_v16 = vadd.f32 %v1357_v8, %v1356_v5 }
 0xa21   :  { %v1359_v13 = vrot.slane %v1358_v16, 2 }
 0xa23   :  { %v1360_v14 = vadd.f32 %v1359_v13, %v1358_v16 }
 0xa25   :  { %v1361_v27 = vrot.slane %v1360_v14, 1 }
 0xa27   :  { %v1362_v28 = vadd.f32 %v1361_v27, %v1360_v14 }
 0xa29   :  { %1363 = vrot.lane.b32.xlu0 %v1362_v28, %s1932_s17 }
 0xa9b   :  { %v1364_v29 = vpop.permute.xlu0 %1363 }
 0xa9c   :  { %v1365_v32 = vadd.f32 %v1364_v29, %v1362_v28 }
 0xa9e   :  { %1366 = vrot.lane.b32.xlu1 %v1365_v32, %s1928_s0 }
 0xb10   :  { %v1367_v33 = vpop.permute.xlu1 %1366 }
 0xb11   :  { %v1368_v34 = vadd.f32 %v1367_v33, %v1365_v32 }
 0xb13   :  { %1369 = vrot.lane.b32.xlu0 %v1368_v34, %s1929_s12 }
 0xb85   :  { %v1370_v41 = vpop.permute.xlu0 %1369 }
 0xb86   :  { %v1371_v57 = vadd.f32 %v1370_v41, %v1368_v34 }
 0xb88   :  { %1372 = vrot.lane.b32.xlu1 %v1371_v57, %s1930_s13 }
 0xbfa   :  { %v1373_v35 = vpop.permute.xlu1 %1372 }
 0xbfb   :  { %v1374_v51 = vadd.f32 %v1373_v35, %v1371_v57 }
 0xbfd   :  { %v1375_v6 = vmul.f32 0.001953125, %v1374_v51 }
 0xbff   :  { %v1379_v63 = vrot.slane %v1375_v6, %v2094_v55 }
 0xc01   :  { %v1380_v19 = vsub.f32 %v1350_v18, %v1379_v63  ;;  %v1381_v39 = vsub.f32 %v1351_v62, %v1379_v63  ;;  %v1382_v17 = vsub.f32 %v1352_v20, %v1379_v63  ;;  %v1383_v21 = vsub.f32 %v1353_v10, %v1379_v63 }
 0xc03   :  { %v1384_v37 = vmul.f32 %v1380_v19, %v1380_v19  ;;  %v1385_v38 = vmul.f32 %v1381_v39, %v1381_v39  ;;  %v1386_v49 = vmul.f32 %v1382_v17, %v1382_v17  ;;  %v1387_v47 = vmul.f32 %v1383_v21, %v1383_v21 }
 0xc05   :  { %v1388_v26 = vadd.f32 %v1385_v38, %v1384_v37 }
 0xc07   :  { %v1389_v36 = vadd.f32 %v1388_v26, %v1386_v49 }
 0xc09   :  { %v1390_v56 = vadd.f32 %v1389_v36, %v1387_v47 }
 0xc0b   :  { %v1391_v3 = vrot.slane %v1390_v56, 4 }
 0xc0d   :  { %v1392_v48 = vadd.f32 %v1391_v3, %v1390_v56 }
 0xc0f   :  { %v1393_v50 = vrot.slane %v1392_v48, 2 }
 0xc11   :  { %v1394_v52 = vadd.f32 %v1393_v50, %v1392_v48 }
 0xc13   :  { %v1395_v15 = vrot.slane %v1394_v52, 1 }
 0xc15   :  { %v1396_v53 = vadd.f32 %v1395_v15, %v1394_v52 }
 0xc17   :  { %1397 = vrot.lane.b32.xlu0 %v1396_v53, %s1932_s17 }
 0xc89   :  { %v1398_v58 = vpop.permute.xlu0 %1397 }
 0xc8a   :  { %v1399_v40 = vadd.f32 %v1398_v58, %v1396_v53 }
 0xc8c   :  { %1400 = vrot.lane.b32.xlu1 %v1399_v40, %s1928_s0 }
 0xcfe   :  { %v1401_v43 = vpop.permute.xlu1 %1400 }
 0xcff   :  { %v1402_v22 = vadd.f32 %v1401_v43, %v1399_v40 }
 0xd01   :  { %1403 = vrot.lane.b32.xlu0 %v1402_v22, %s1929_s12 }
 0xd73   :  { %v1404_v59 = vpop.permute.xlu0 %1403 }
 0xd74   :  { %v1405_v44 = vadd.f32 %v1404_v59, %v1402_v22 }
 0xd76   :  { %1406 = vrot.lane.b32.xlu1 %v1405_v44, %s1930_s13 }
 0xde8   :  { %v1407_v60 = vpop.permute.xlu1 %1406 }
 0xde9   :  { %v1408_v42 = vadd.f32 %v1407_v60, %v1405_v44 }
 0xdeb   :  { %v1409_v61 = vmul.f32 0.001953125, %v1408_v42 }
 0xded   :  { %v1410_v1 = vadd.f32 1e-05, %v1409_v61 }
 0xdef   :  { %1925 = vrsqrt.f32 %v1410_v1 }
 0xdf9   :  { %v1926_v2 = vpop.eup %1925 }
 0xdfa   :  { %v1412_v45 = vmul.f32 %v1926_v2, %v1257_v9 }
 0xdfc   :  { %v1417_v46 = vrot.slane %v1412_v45, %v2094_v55 }
 0xdfe   :  { %v1419_v7 = vmul.f32 %v1417_v46, %v1380_v19  ;;  %v1420_v11 = vmul.f32 %v1417_v46, %v1381_v39  ;;  %v1421_v23 = vmul.f32 %v1417_v46, %v1382_v17  ;;  %v1422_v62 = vmul.f32 %v1417_v46, %v1383_v21 }
 0xe00   :  { %v1429_v30 = vadd.f32 %v1582_v54, %v1419_v7  ;;  %v1430_v0 = vadd.f32 %v1582_v54, %v1420_v11  ;;  %v1431_v12 = vadd.f32 %v1582_v54, %v1421_v23  ;;  %v1432_v18 = vadd.f32 %v1582_v54, %v1422_v62 }
 0xe02   :  { %1433 = vst [vmem:[%s3154_s8] sm:$0xff] %v1429_v30  ;;  %1434 = vst [vmem:[%s3154_s8 + $0x8] sm:$0xff] %v1430_v0 }
 0xe03   :  { %1435 = vst [vmem:[%s3154_s8 + $0x10] sm:$0xff] %v1431_v12  ;;  %1436 = vst [vmem:[%s3154_s8 + $0x18] sm:$0xff] %v1432_v18 }

</bundles_post_ra>
